<compile_context>
chip_gen: v5e
topology: v5e:2x2
jax: 0.10.0
libtpu: 0.0.40
codegen_flags: <defaults>
</compile_context>

<pallas_src>
import functools

import jax
import jax.numpy as jnp
from jax.experimental import pallas as pl
from jax.experimental.pallas import tpu as pltpu

LATENT_DIM = 128


# ----------------------------------------------------------------------------
# Fused encoder kernel (one batch block per grid step)
# ----------------------------------------------------------------------------
def _encoder_fused_kernel(x1_ref, w1_ref, w2_ref, b2_ref, w3_ref, b3_ref,
                          o_ref, y1f_ref, x2w_ref, y2p_ref, x3w_ref,
                          *, bblk, h2, w2):
    """x1_ref : (bblk, h2+1, w2+1, 196) bf16  conv1 im2col(+bias tap) input,
                                              zero-padded & 2x2 phase-folded
       w1_ref : (196, 256) bf16  block-diag conv1 weight (bias row folded in)
       w2_ref : (2, 512, 128) bf16  conv2 weight: (kh-tap, kw|phase|cin, cout)
       b2_ref : (1, 128) f32
       w3_ref : (3, 384, LATENT) bf16  conv3 weight: (kh-tap, kw|cin, cout)
       b3_ref : (1, LATENT) f32
       o_ref  : (bblk, h2, w2, LATENT) f32
       scratches (VMEM bf16):
         y1f : (bblk, h2+1, w2+1, 256)  conv1 out == conv2 folded+padded input
         x2w : (bblk, h2+1, w2, 512)    conv2 input with kw taps folded (K=512)
         y2p : (bblk, h2+2, w2+2, 128)  zero-padded conv2 output
         x3w : (bblk, h2+2, w2, 384)    conv3 input with kw taps folded (K=384)
    """
    m = bblk * h2 * w2
    mf = bblk * (h2 + 1) * (w2 + 1)
    kin = x1_ref.shape[-1]          # 196
    cf = y1f_ref.shape[-1]          # 256 (4 phases x 64)
    c2 = b2_ref.shape[-1]           # 128
    c3 = o_ref.shape[-1]            # LATENT_DIM

    # --- conv1 (+bias +ReLU): one matmul, result is already conv2's
    #     zero-padded, phase-folded input (out-of-range taps give relu(0)=0).
    x1 = x1_ref[...].reshape(mf, kin)
    y1 = jnp.dot(x1, w1_ref[...], preferred_element_type=jnp.float32)
    y1 = jnp.maximum(y1, 0.0).astype(jnp.bfloat16)
    y1f_ref[...] = y1.reshape(bblk, h2 + 1, w2 + 1, cf)

    # --- conv2 (k4 s2 p1) == 2x2-tap stride-1 conv on the folded input.
    #     Pre-fold the two kw taps into channels once (lane-aligned stores),
    #     then 2 kh-tap matmuls over major-axis slices.
    for b in range(2):
        x2w_ref[:, :, :, b * cf:(b + 1) * cf] = y1f_ref[:, :, b:b + w2, :]
    acc2 = jnp.zeros((m, c2), jnp.float32)
    for a in range(2):
        xa = x2w_ref[:, a:a + h2, :, :].reshape(m, 2 * cf)
        acc2 = acc2 + jnp.dot(xa, w2_ref[a], preferred_element_type=jnp.float32)
    y2 = jnp.maximum(acc2 + b2_ref[...], 0.0).astype(jnp.bfloat16)

    # --- zero-padded conv2 output stays in VMEM for conv3.
    y2p_ref[...] = jnp.zeros_like(y2p_ref)
    y2p_ref[:, 1:h2 + 1, 1:w2 + 1, :] = y2.reshape(bblk, h2, w2, c2)

    # --- conv3 (k3 s1 p1): pre-fold 3 kw taps (K=384), 3 kh-tap matmuls.
    for b in range(3):
        x3w_ref[:, :, :, b * c2:(b + 1) * c2] = y2p_ref[:, :, b:b + w2, :]
    acc3 = jnp.zeros((m, c3), jnp.float32)
    for a in range(3):
        xa = x3w_ref[:, a:a + h2, :, :].reshape(m, 3 * c2)
        acc3 = acc3 + jnp.dot(xa, w3_ref[a], preferred_element_type=jnp.float32)
    acc3 = acc3 + b3_ref[...]
    o_ref[...] = acc3.reshape(bblk, h2, w2, c3).astype(o_ref.dtype)


# ----------------------------------------------------------------------------
# Wrapper-side layout glue (cheap, runs once per forward in XLA)
# ----------------------------------------------------------------------------
def _conv1_folded_input(x_nhwc):
    """(N,H,W,3) bf16 -> (N, H//4+1, W//4+1, 4*49) bf16.
    k4/s2/p1 im2col (K order = kh, kw, cin) + constant-1 bias tap, then
    zero-padded by 1 and 2x2 phase-folded into channels -- i.e. exactly the
    geometry conv2 consumes.  Out-of-range taps (incl. the bias tap) are 0."""
    n, h, w, _ = x_nhwc.shape
    h1, w1 = h // 2, w // 2
    xp = jnp.pad(x_nhwc, ((0, 0), (1, 1), (1, 1), (0, 0)))
    cols = [xp[:, a:a + 2 * h1:2, b:b + 2 * w1:2, :]
            for a in range(4) for b in range(4)]
    cols.append(jnp.ones((n, h1, w1, 1), x_nhwc.dtype))
    x1 = jnp.concatenate(cols, axis=-1)                     # (n, h1, w1, 49)
    x1 = jnp.pad(x1, ((0, 0), (1, 1), (1, 1), (0, 0)))      # (n, h1+2, w1+2, 49)
    h2, w2 = h1 // 2, w1 // 2
    x1 = x1.reshape(n, h2 + 1, 2, w2 + 1, 2, 49)
    x1 = jnp.transpose(x1, (0, 1, 3, 2, 4, 5))              # (n, R, C, p, q, 49)
    return x1.reshape(n, h2 + 1, w2 + 1, 4 * 49)


def _prep_w1_blockdiag(w_oihw, bias):
    """Conv1 OIHW (64,3,4,4) + bias -> block-diagonal (4*49, 4*64) matrix."""
    cout, cin, kh, kw = w_oihw.shape
    wk = jnp.transpose(w_oihw, (2, 3, 1, 0)).reshape(kh * kw * cin, cout)
    wkb = jnp.concatenate([wk, bias.reshape(1, cout)], axis=0)      # (49, 64)
    k1 = kh * kw * cin + 1
    w = jnp.zeros((4 * k1, 4 * cout), wkb.dtype)
    for ph in range(4):
        w = w.at[ph * k1:(ph + 1) * k1, ph * cout:(ph + 1) * cout].set(wkb)
    return w


def _prep_w2(w_oihw):
    """Conv2 OIHW (128,64,4,4) -> (2, 512, 128): kh-tap a, contraction index
    = kw-tap*256 + p*128 + q*64 + cin, matching the folded y1 layout."""
    cout, cin, kh, kw = w_oihw.shape
    w = jnp.transpose(w_oihw, (2, 3, 1, 0))          # (kh, kw, cin, cout)
    w = w.reshape(2, 2, 2, 2, cin, cout)             # (a, p, b, q, cin, cout)
    w = jnp.transpose(w, (0, 2, 1, 3, 4, 5))         # (a, b, p, q, cin, cout)
    return w.reshape(2, 2 * 4 * cin, cout)


def _prep_w3(w_oihw):
    """Conv3 OIHW (128,128,3,3) -> (3, 384, 128): kh-tap a, K = kw*128 + cin."""
    cout, cin, kh, kw = w_oihw.shape
    w = jnp.transpose(w_oihw, (2, 3, 1, 0))
    return w.reshape(kh, kw * cin, cout)


def prepare_params(params):
    """One-time weight layout transform + bf16 cast (hoisted out of forward)."""
    return {
        "w1": _prep_w1_blockdiag(params["w1"], params["b1"]).astype(jnp.bfloat16),
        "w2": _prep_w2(params["w2"]).astype(jnp.bfloat16),
        "b2": params["b2"].reshape(1, -1).astype(jnp.float32),
        "w3": _prep_w3(params["w3"]).astype(jnp.bfloat16),
        "b3": params["b3"].reshape(1, -1).astype(jnp.float32),
    }


def _pick_batch_block(n, m2, target_m=256):
    """Largest divisor of n with bblk*m2 <= target_m, keeping >= 2 grid steps
    (v7x has 2 TensorCores; on v5e/v6e the grid is a serial loop anyway)."""
    cap = max(1, target_m // max(m2, 1))
    if n >= 2:
        cap = min(cap, max(1, n // 2))
    cap = min(cap, n)
    for b in range(cap, 0, -1):
        if n % b == 0:
            return b
    return 1


# ----------------------------------------------------------------------------
# Encoder forward
# ----------------------------------------------------------------------------
def init_encoder_params(key):
    ks = jax.random.split(key, 6)
    scale = 0.05
    return {
        "w1": scale * jax.random.normal(ks[0], (64, 3, 4, 4), jnp.float32),
        "b1": scale * jax.random.normal(ks[1], (64,), jnp.float32),
        "w2": scale * jax.random.normal(ks[2], (128, 64, 4, 4), jnp.float32),
        "b2": scale * jax.random.normal(ks[3], (128,), jnp.float32),
        "w3": scale * jax.random.normal(ks[4], (LATENT_DIM, 128, 3, 3), jnp.float32),
        "b3": scale * jax.random.normal(ks[5], (LATENT_DIM,), jnp.float32),
    }


@jax.jit
def encoder_forward(prep, x_nchw):
    n, c, h, w = x_nchw.shape
    assert c == 3 and h % 4 == 0 and w % 4 == 0, "need 3 chans, H/W % 4 == 0"
    h2, w2 = h // 4, w // 4

    x = jnp.transpose(x_nchw, (0, 2, 3, 1)).astype(jnp.bfloat16)     # NHWC bf16
    x1f = _conv1_folded_input(x)                        # (n, h2+1, w2+1, 196)
    kin = x1f.shape[-1]

    bblk = _pick_batch_block(n, h2 * w2)
    grid = (n // bblk,)
    kernel = functools.partial(_encoder_fused_kernel, bblk=bblk, h2=h2, w2=w2)

    y3 = pl.pallas_call(
        kernel,
        out_shape=jax.ShapeDtypeStruct((n, h2, w2, LATENT_DIM), jnp.float32),
        grid_spec=pltpu.PrefetchScalarGridSpec(
            num_scalar_prefetch=0,
            grid=grid,
            in_specs=[
                pl.BlockSpec((bblk, h2 + 1, w2 + 1, kin), lambda i: (i, 0, 0, 0)),
                pl.BlockSpec((kin, 256), lambda i: (0, 0)),
                pl.BlockSpec((2, 512, 128), lambda i: (0, 0, 0)),
                pl.BlockSpec((1, 128), lambda i: (0, 0)),
                pl.BlockSpec((3, 384, LATENT_DIM), lambda i: (0, 0, 0)),
                pl.BlockSpec((1, LATENT_DIM), lambda i: (0, 0)),
            ],
            out_specs=pl.BlockSpec((bblk, h2, w2, LATENT_DIM),
                                   lambda i: (i, 0, 0, 0)),
            scratch_shapes=[
                pltpu.VMEM((bblk, h2 + 1, w2 + 1, 256), jnp.bfloat16),
                pltpu.VMEM((bblk, h2 + 1, w2, 512), jnp.bfloat16),
                pltpu.VMEM((bblk, h2 + 2, w2 + 2, 128), jnp.bfloat16),
                pltpu.VMEM((bblk, h2 + 2, w2, 384), jnp.bfloat16),
            ],
        ),
        compiler_params=pltpu.CompilerParams(
            dimension_semantics=("parallel",)),
    )(x1f, prep["w1"], prep["w2"], prep["b2"], prep["w3"], prep["b3"])

    return jnp.transpose(y3, (0, 3, 1, 2))                           # NCHW f32


# ----------------------------------------------------------------------------
# Pure-JAX reference (lax.conv) for a correctness sanity check.
# NOTE: the kernel uses bf16 activations/weights internally, so agreement with
# the all-f32 reference is ~1e-2, well inside the 5e-2 tolerance below.
# ----------------------------------------------------------------------------
def _ref_forward(params, x_nchw):
    def conv(x, w, b, stride, pad, relu):
        y = jax.lax.conv_general_dilated(
            x, w, window_strides=(stride, stride),
            padding=[(pad, pad), (pad, pad)],
            dimension_numbers=("NCHW", "OIHW", "NCHW"),
            precision=jax.lax.Precision.HIGHEST)
        y = y + b[None, :, None, None]
        return jnp.maximum(y, 0.0) if relu else y

    x = conv(x_nchw, params["w1"], params["b1"], 2, 1, True)
    x = conv(x, params["w2"], params["b2"], 2, 1, True)
    x = conv(x, params["w3"], params["b3"], 1, 1, False)
    return x


if __name__ == "__main__":
    key = jax.random.PRNGKey(0)
    pkey, xkey = jax.random.split(key)
    params = init_encoder_params(pkey)
    prep = prepare_params(params)

    # Small input consistent with the module: NCHW, 3 input channels.
    x = jax.random.normal(xkey, (2, 3, 16, 16), jnp.float32)

    out = jax.block_until_ready(encoder_forward(prep, x))
    assert out.shape == (2, LATENT_DIM, 4, 4), out.shape

    ref = _ref_forward(params, x)
    max_err = float(jnp.max(jnp.abs(out - ref)))
    assert max_err < 5e-2, max_err

    print("KERNEL_OK")
</pallas_src>

<mosaic_0001>
module attributes {stable_mosaic.version = 11 : i64} {
  func.func @_encoder_fused_kernel(%arg0: i32, %arg1: memref<1x5x5x196xbf16, #tpu.memory_space<vmem>>, %arg2: memref<196x256xbf16, #tpu.memory_space<vmem>>, %arg3: memref<2x512x128xbf16, #tpu.memory_space<vmem>>, %arg4: memref<1x128xf32, #tpu.memory_space<vmem>>, %arg5: memref<3x384x128xbf16, #tpu.memory_space<vmem>>, %arg6: memref<1x128xf32, #tpu.memory_space<vmem>>, %arg7: memref<1x4x4x128xf32, #tpu.memory_space<vmem>>, %arg8: memref<1x5x5x256xbf16, #tpu.memory_space<vmem>>, %arg9: memref<1x5x4x512xbf16, #tpu.memory_space<vmem>>, %arg10: memref<1x6x6x128xbf16, #tpu.memory_space<vmem>>, %arg11: memref<1x6x4x384xbf16, #tpu.memory_space<vmem>>) attributes {dimension_semantics = [#tpu.dimension_semantics<parallel>], iteration_bounds = array<i64: 2>, scalar_prefetch = 0 : i64, scratch_operands = 4 : i64, tpu.core_type = #tpu.core_type<tc>, window_params = [{transform_indices = @transform_0, window_bounds = array<i64: 1, 5, 5, 196>}, {pipeline_mode = #tpu.pipeline_mode<synchronous>, transform_indices = @transform_1, window_bounds = array<i64: 196, 256>}, {pipeline_mode = #tpu.pipeline_mode<synchronous>, transform_indices = @transform_2, window_bounds = array<i64: 2, 512, 128>}, {pipeline_mode = #tpu.pipeline_mode<synchronous>, transform_indices = @transform_3, window_bounds = array<i64: 1, 128>}, {pipeline_mode = #tpu.pipeline_mode<synchronous>, transform_indices = @transform_4, window_bounds = array<i64: 3, 384, 128>}, {pipeline_mode = #tpu.pipeline_mode<synchronous>, transform_indices = @transform_5, window_bounds = array<i64: 1, 128>}, {transform_indices = @transform_6, window_bounds = array<i64: 1, 4, 4, 128>}]} {
    %c0 = arith.constant 0 : index
    %c0_0 = arith.constant 0 : index
    %c0_1 = arith.constant 0 : index
    %c0_2 = arith.constant 0 : index
    %0 = vector.load %arg1[%c0, %c0_0, %c0_1, %c0_2] : memref<1x5x5x196xbf16, #tpu.memory_space<vmem>>, vector<1x5x5x196xbf16>
    %1 = vector.shape_cast %0 : vector<1x5x5x196xbf16> to vector<25x196xbf16>
    %c0_3 = arith.constant 0 : index
    %c0_4 = arith.constant 0 : index
    %2 = vector.load %arg2[%c0_3, %c0_4] : memref<196x256xbf16, #tpu.memory_space<vmem>>, vector<196x256xbf16>
    %cst = arith.constant dense<0.000000e+00> : vector<25x256xf32>
    %3 = tpu.matmul %1, %2, %cst {dimension_numbers = #tpu.dot_dimension_numbers<[1], [0], [0], [1], [0, 0, 1, 1], [], []>} : vector<25x196xbf16>, vector<196x256xbf16>, vector<25x256xf32> -> vector<25x256xf32>
    %cst_5 = arith.constant 0.000000e+00 : f32
    %4 = vector.broadcast %cst_5 : f32 to vector<25x256xf32>
    %5 = arith.maximumf %3, %4 : vector<25x256xf32>
    %6 = arith.truncf %5 : vector<25x256xf32> to vector<25x256xbf16>
    %7 = vector.shape_cast %6 : vector<25x256xbf16> to vector<1x5x5x256xbf16>
    %c0_6 = arith.constant 0 : index
    %c0_7 = arith.constant 0 : index
    %c0_8 = arith.constant 0 : index
    %c0_9 = arith.constant 0 : index
    %8 = vector.load %arg8[%c0_6, %c0_7, %c0_8, %c0_9] : memref<1x5x5x256xbf16, #tpu.memory_space<vmem>>, vector<1x5x5x256xbf16>
    tpu.vector_store %arg8[%c0_6, %c0_7, %c0_8, %c0_9], %7 {strides = array<i32>} : memref<1x5x5x256xbf16, #tpu.memory_space<vmem>>, vector<1x5x5x256xbf16>,
    %c0_10 = arith.constant 0 : index
    %c0_11 = arith.constant 0 : index
    %c0_12 = arith.constant 0 : index
    %c0_13 = arith.constant 0 : index
    %9 = vector.load %arg8[%c0_10, %c0_11, %c0_12, %c0_13] : memref<1x5x5x256xbf16, #tpu.memory_space<vmem>>, vector<1x5x4x256xbf16>
    %c0_14 = arith.constant 0 : index
    %c0_15 = arith.constant 0 : index
    %c0_16 = arith.constant 0 : index
    %c0_17 = arith.constant 0 : index
    %10 = vector.load %arg9[%c0_14, %c0_15, %c0_16, %c0_17] : memref<1x5x4x512xbf16, #tpu.memory_space<vmem>>, vector<1x5x4x256xbf16>
    tpu.vector_store %arg9[%c0_14, %c0_15, %c0_16, %c0_17], %9 {strides = array<i32>} : memref<1x5x4x512xbf16, #tpu.memory_space<vmem>>, vector<1x5x4x256xbf16>,
    %c0_18 = arith.constant 0 : index
    %c0_19 = arith.constant 0 : index
    %c1 = arith.constant 1 : index
    %c0_20 = arith.constant 0 : index
    %11 = vector.load %arg8[%c0_18, %c0_19, %c1, %c0_20] : memref<1x5x5x256xbf16, #tpu.memory_space<vmem>>, vector<1x5x4x256xbf16>
    %c0_21 = arith.constant 0 : index
    %c0_22 = arith.constant 0 : index
    %c0_23 = arith.constant 0 : index
    %c256 = arith.constant 256 : index
    %12 = vector.load %arg9[%c0_21, %c0_22, %c0_23, %c256] : memref<1x5x4x512xbf16, #tpu.memory_space<vmem>>, vector<1x5x4x256xbf16>
    tpu.vector_store %arg9[%c0_21, %c0_22, %c0_23, %c256], %11 {strides = array<i32>} : memref<1x5x4x512xbf16, #tpu.memory_space<vmem>>, vector<1x5x4x256xbf16>,
    %cst_24 = arith.constant 0.000000e+00 : f32
    %13 = vector.broadcast %cst_24 : f32 to vector<16x128xf32>
    %c0_25 = arith.constant 0 : index
    %c0_26 = arith.constant 0 : index
    %c0_27 = arith.constant 0 : index
    %c0_28 = arith.constant 0 : index
    %14 = vector.load %arg9[%c0_25, %c0_26, %c0_27, %c0_28] : memref<1x5x4x512xbf16, #tpu.memory_space<vmem>>, vector<1x4x4x512xbf16>
    %15 = vector.shape_cast %14 : vector<1x4x4x512xbf16> to vector<16x512xbf16>
    %c0_29 = arith.constant 0 : index
    %c0_30 = arith.constant 0 : index
    %c0_31 = arith.constant 0 : index
    %16 = vector.load %arg3[%c0_29, %c0_30, %c0_31] : memref<2x512x128xbf16, #tpu.memory_space<vmem>>, vector<1x512x128xbf16>
    %17 = vector.shape_cast %16 : vector<1x512x128xbf16> to vector<512x128xbf16>
    %cst_32 = arith.constant dense<0.000000e+00> : vector<16x128xf32>
    %18 = tpu.matmul %15, %17, %cst_32 {dimension_numbers = #tpu.dot_dimension_numbers<[1], [0], [0], [1], [0, 0, 1, 1], [], []>} : vector<16x512xbf16>, vector<512x128xbf16>, vector<16x128xf32> -> vector<16x128xf32>
    %19 = arith.addf %13, %18 : vector<16x128xf32>
    %c0_33 = arith.constant 0 : index
    %c1_34 = arith.constant 1 : index
    %c0_35 = arith.constant 0 : index
    %c0_36 = arith.constant 0 : index
    %20 = vector.load %arg9[%c0_33, %c1_34, %c0_35, %c0_36] : memref<1x5x4x512xbf16, #tpu.memory_space<vmem>>, vector<1x4x4x512xbf16>
    %21 = vector.shape_cast %20 : vector<1x4x4x512xbf16> to vector<16x512xbf16>
    %c1_37 = arith.constant 1 : index
    %c0_38 = arith.constant 0 : index
    %c0_39 = arith.constant 0 : index
    %22 = vector.load %arg3[%c1_37, %c0_38, %c0_39] : memref<2x512x128xbf16, #tpu.memory_space<vmem>>, vector<1x512x128xbf16>
    %23 = vector.shape_cast %22 : vector<1x512x128xbf16> to vector<512x128xbf16>
    %cst_40 = arith.constant dense<0.000000e+00> : vector<16x128xf32>
    %24 = tpu.matmul %21, %23, %cst_40 {dimension_numbers = #tpu.dot_dimension_numbers<[1], [0], [0], [1], [0, 0, 1, 1], [], []>} : vector<16x512xbf16>, vector<512x128xbf16>, vector<16x128xf32> -> vector<16x128xf32>
    %25 = arith.addf %19, %24 : vector<16x128xf32>
    %c0_41 = arith.constant 0 : index
    %c0_42 = arith.constant 0 : index
    %26 = vector.load %arg4[%c0_41, %c0_42] : memref<1x128xf32, #tpu.memory_space<vmem>>, vector<1x128xf32>
    %27 = vector.broadcast %26 : vector<1x128xf32> to vector<16x128xf32>
    %28 = arith.addf %25, %27 : vector<16x128xf32>
    %cst_43 = arith.constant 0.000000e+00 : f32
    %29 = vector.broadcast %cst_43 : f32 to vector<16x128xf32>
    %30 = arith.maximumf %28, %29 : vector<16x128xf32>
    %31 = arith.truncf %30 : vector<16x128xf32> to vector<16x128xbf16>
    %cst_44 = arith.constant 0.000000e+00 : bf16
    %32 = vector.broadcast %cst_44 : bf16 to vector<1x6x6x128xbf16>
    %c0_45 = arith.constant 0 : index
    %c0_46 = arith.constant 0 : index
    %c0_47 = arith.constant 0 : index
    %c0_48 = arith.constant 0 : index
    %33 = vector.load %arg10[%c0_45, %c0_46, %c0_47, %c0_48] : memref<1x6x6x128xbf16, #tpu.memory_space<vmem>>, vector<1x6x6x128xbf16>
    tpu.vector_store %arg10[%c0_45, %c0_46, %c0_47, %c0_48], %32 {strides = array<i32>} : memref<1x6x6x128xbf16, #tpu.memory_space<vmem>>, vector<1x6x6x128xbf16>,
    %34 = vector.shape_cast %31 : vector<16x128xbf16> to vector<1x4x4x128xbf16>
    %c0_49 = arith.constant 0 : index
    %c1_50 = arith.constant 1 : index
    %c1_51 = arith.constant 1 : index
    %c0_52 = arith.constant 0 : index
    %35 = vector.load %arg10[%c0_49, %c1_50, %c1_51, %c0_52] : memref<1x6x6x128xbf16, #tpu.memory_space<vmem>>, vector<1x4x4x128xbf16>
    tpu.vector_store %arg10[%c0_49, %c1_50, %c1_51, %c0_52], %34 {strides = array<i32>} : memref<1x6x6x128xbf16, #tpu.memory_space<vmem>>, vector<1x4x4x128xbf16>,
    %c0_53 = arith.constant 0 : index
    %c0_54 = arith.constant 0 : index
    %c0_55 = arith.constant 0 : index
    %c0_56 = arith.constant 0 : index
    %36 = vector.load %arg10[%c0_53, %c0_54, %c0_55, %c0_56] : memref<1x6x6x128xbf16, #tpu.memory_space<vmem>>, vector<1x6x4x128xbf16>
    %c0_57 = arith.constant 0 : index
    %c0_58 = arith.constant 0 : index
    %c0_59 = arith.constant 0 : index
    %c0_60 = arith.constant 0 : index
    %37 = vector.load %arg11[%c0_57, %c0_58, %c0_59, %c0_60] : memref<1x6x4x384xbf16, #tpu.memory_space<vmem>>, vector<1x6x4x128xbf16>
    tpu.vector_store %arg11[%c0_57, %c0_58, %c0_59, %c0_60], %36 {strides = array<i32>} : memref<1x6x4x384xbf16, #tpu.memory_space<vmem>>, vector<1x6x4x128xbf16>,
    %c0_61 = arith.constant 0 : index
    %c0_62 = arith.constant 0 : index
    %c1_63 = arith.constant 1 : index
    %c0_64 = arith.constant 0 : index
    %38 = vector.load %arg10[%c0_61, %c0_62, %c1_63, %c0_64] : memref<1x6x6x128xbf16, #tpu.memory_space<vmem>>, vector<1x6x4x128xbf16>
    %c0_65 = arith.constant 0 : index
    %c0_66 = arith.constant 0 : index
    %c0_67 = arith.constant 0 : index
    %c128 = arith.constant 128 : index
    %39 = vector.load %arg11[%c0_65, %c0_66, %c0_67, %c128] : memref<1x6x4x384xbf16, #tpu.memory_space<vmem>>, vector<1x6x4x128xbf16>
    tpu.vector_store %arg11[%c0_65, %c0_66, %c0_67, %c128], %38 {strides = array<i32>} : memref<1x6x4x384xbf16, #tpu.memory_space<vmem>>, vector<1x6x4x128xbf16>,
    %c0_68 = arith.constant 0 : index
    %c0_69 = arith.constant 0 : index
    %c2 = arith.constant 2 : index
    %c0_70 = arith.constant 0 : index
    %40 = vector.load %arg10[%c0_68, %c0_69, %c2, %c0_70] : memref<1x6x6x128xbf16, #tpu.memory_space<vmem>>, vector<1x6x4x128xbf16>
    %c0_71 = arith.constant 0 : index
    %c0_72 = arith.constant 0 : index
    %c0_73 = arith.constant 0 : index
    %c256_74 = arith.constant 256 : index
    %41 = vector.load %arg11[%c0_71, %c0_72, %c0_73, %c256_74] : memref<1x6x4x384xbf16, #tpu.memory_space<vmem>>, vector<1x6x4x128xbf16>
    tpu.vector_store %arg11[%c0_71, %c0_72, %c0_73, %c256_74], %40 {strides = array<i32>} : memref<1x6x4x384xbf16, #tpu.memory_space<vmem>>, vector<1x6x4x128xbf16>,
    %cst_75 = arith.constant 0.000000e+00 : f32
    %42 = vector.broadcast %cst_75 : f32 to vector<16x128xf32>
    %c0_76 = arith.constant 0 : index
    %c0_77 = arith.constant 0 : index
    %c0_78 = arith.constant 0 : index
    %c0_79 = arith.constant 0 : index
    %43 = vector.load %arg11[%c0_76, %c0_77, %c0_78, %c0_79] : memref<1x6x4x384xbf16, #tpu.memory_space<vmem>>, vector<1x4x4x384xbf16>
    %44 = vector.shape_cast %43 : vector<1x4x4x384xbf16> to vector<16x384xbf16>
    %c0_80 = arith.constant 0 : index
    %c0_81 = arith.constant 0 : index
    %c0_82 = arith.constant 0 : index
    %45 = vector.load %arg5[%c0_80, %c0_81, %c0_82] : memref<3x384x128xbf16, #tpu.memory_space<vmem>>, vector<1x384x128xbf16>
    %46 = vector.shape_cast %45 : vector<1x384x128xbf16> to vector<384x128xbf16>
    %cst_83 = arith.constant dense<0.000000e+00> : vector<16x128xf32>
    %47 = tpu.matmul %44, %46, %cst_83 {dimension_numbers = #tpu.dot_dimension_numbers<[1], [0], [0], [1], [0, 0, 1, 1], [], []>} : vector<16x384xbf16>, vector<384x128xbf16>, vector<16x128xf32> -> vector<16x128xf32>
    %48 = arith.addf %42, %47 : vector<16x128xf32>
    %c0_84 = arith.constant 0 : index
    %c1_85 = arith.constant 1 : index
    %c0_86 = arith.constant 0 : index
    %c0_87 = arith.constant 0 : index
    %49 = vector.load %arg11[%c0_84, %c1_85, %c0_86, %c0_87] : memref<1x6x4x384xbf16, #tpu.memory_space<vmem>>, vector<1x4x4x384xbf16>
    %50 = vector.shape_cast %49 : vector<1x4x4x384xbf16> to vector<16x384xbf16>
    %c1_88 = arith.constant 1 : index
    %c0_89 = arith.constant 0 : index
    %c0_90 = arith.constant 0 : index
    %51 = vector.load %arg5[%c1_88, %c0_89, %c0_90] : memref<3x384x128xbf16, #tpu.memory_space<vmem>>, vector<1x384x128xbf16>
    %52 = vector.shape_cast %51 : vector<1x384x128xbf16> to vector<384x128xbf16>
    %cst_91 = arith.constant dense<0.000000e+00> : vector<16x128xf32>
    %53 = tpu.matmul %50, %52, %cst_91 {dimension_numbers = #tpu.dot_dimension_numbers<[1], [0], [0], [1], [0, 0, 1, 1], [], []>} : vector<16x384xbf16>, vector<384x128xbf16>, vector<16x128xf32> -> vector<16x128xf32>
    %54 = arith.addf %48, %53 : vector<16x128xf32>
    %c0_92 = arith.constant 0 : index
    %c2_93 = arith.constant 2 : index
    %c0_94 = arith.constant 0 : index
    %c0_95 = arith.constant 0 : index
    %55 = vector.load %arg11[%c0_92, %c2_93, %c0_94, %c0_95] : memref<1x6x4x384xbf16, #tpu.memory_space<vmem>>, vector<1x4x4x384xbf16>
    %56 = vector.shape_cast %55 : vector<1x4x4x384xbf16> to vector<16x384xbf16>
    %c2_96 = arith.constant 2 : index
    %c0_97 = arith.constant 0 : index
    %c0_98 = arith.constant 0 : index
    %57 = vector.load %arg5[%c2_96, %c0_97, %c0_98] : memref<3x384x128xbf16, #tpu.memory_space<vmem>>, vector<1x384x128xbf16>
    %58 = vector.shape_cast %57 : vector<1x384x128xbf16> to vector<384x128xbf16>
    %cst_99 = arith.constant dense<0.000000e+00> : vector<16x128xf32>
    %59 = tpu.matmul %56, %58, %cst_99 {dimension_numbers = #tpu.dot_dimension_numbers<[1], [0], [0], [1], [0, 0, 1, 1], [], []>} : vector<16x384xbf16>, vector<384x128xbf16>, vector<16x128xf32> -> vector<16x128xf32>
    %60 = arith.addf %54, %59 : vector<16x128xf32>
    %c0_100 = arith.constant 0 : index
    %c0_101 = arith.constant 0 : index
    %61 = vector.load %arg6[%c0_100, %c0_101] : memref<1x128xf32, #tpu.memory_space<vmem>>, vector<1x128xf32>
    %62 = vector.broadcast %61 : vector<1x128xf32> to vector<16x128xf32>
    %63 = arith.addf %60, %62 : vector<16x128xf32>
    %64 = vector.shape_cast %63 : vector<16x128xf32> to vector<1x4x4x128xf32>
    %c0_102 = arith.constant 0 : index
    %c0_103 = arith.constant 0 : index
    %c0_104 = arith.constant 0 : index
    %c0_105 = arith.constant 0 : index
    %65 = vector.load %arg7[%c0_102, %c0_103, %c0_104, %c0_105] : memref<1x4x4x128xf32, #tpu.memory_space<vmem>>, vector<1x4x4x128xf32>
    tpu.vector_store %arg7[%c0_102, %c0_103, %c0_104, %c0_105], %64 {strides = array<i32>} : memref<1x4x4x128xf32, #tpu.memory_space<vmem>>, vector<1x4x4x128xf32>,
    return
  }
  func.func @transform_0(%arg0: i32) -> (i32, i32, i32, i32) {
    %c0_i32 = arith.constant 0 : i32
    %c0_i32_0 = arith.constant 0 : i32
    %c0_i32_1 = arith.constant 0 : i32
    %c0_i32_2 = arith.constant 0 : i32
    return %arg0, %c0_i32, %c0_i32_0, %c0_i32_1 : i32, i32, i32, i32
  }
  func.func @transform_1(%arg0: i32) -> (i32, i32) {
    %c0_i32 = arith.constant 0 : i32
    %c0_i32_0 = arith.constant 0 : i32
    %c0_i32_1 = arith.constant 0 : i32
    return %c0_i32, %c0_i32_0 : i32, i32
  }
  func.func @transform_2(%arg0: i32) -> (i32, i32, i32) {
    %c0_i32 = arith.constant 0 : i32
    %c0_i32_0 = arith.constant 0 : i32
    %c0_i32_1 = arith.constant 0 : i32
    %c0_i32_2 = arith.constant 0 : i32
    return %c0_i32, %c0_i32_0, %c0_i32_1 : i32, i32, i32
  }
  func.func @transform_3(%arg0: i32) -> (i32, i32) {
    %c0_i32 = arith.constant 0 : i32
    %c0_i32_0 = arith.constant 0 : i32
    %c0_i32_1 = arith.constant 0 : i32
    return %c0_i32, %c0_i32_0 : i32, i32
  }
  func.func @transform_4(%arg0: i32) -> (i32, i32, i32) {
    %c0_i32 = arith.constant 0 : i32
    %c0_i32_0 = arith.constant 0 : i32
    %c0_i32_1 = arith.constant 0 : i32
    %c0_i32_2 = arith.constant 0 : i32
    return %c0_i32, %c0_i32_0, %c0_i32_1 : i32, i32, i32
  }
  func.func @transform_5(%arg0: i32) -> (i32, i32) {
    %c0_i32 = arith.constant 0 : i32
    %c0_i32_0 = arith.constant 0 : i32
    %c0_i32_1 = arith.constant 0 : i32
    return %c0_i32, %c0_i32_0 : i32, i32
  }
  func.func @transform_6(%arg0: i32) -> (i32, i32, i32, i32) {
    %c0_i32 = arith.constant 0 : i32
    %c0_i32_0 = arith.constant 0 : i32
    %c0_i32_1 = arith.constant 0 : i32
    %c0_i32_2 = arith.constant 0 : i32
    return %arg0, %c0_i32, %c0_i32_0, %c0_i32_1 : i32, i32, i32, i32
  }
}

</mosaic_0001>

<bundles_post_ra>
// kernel: encoder_forward.1
= control target key start
LH: loop header
LB: loop body
LE: loop exit
PB: predicated region body
PF: predicated region fallthrough
CT: control target
= control target key end

     0   :  { %11 = vsyncpa [#allocation7], 0  ;;  %s4887_s0 = inlined_call_operand.vmem [shape: bf16[2,5,5,196], index: 0, kind: input, shape index: {}]   ;;  %s4888_s1 = inlined_call_operand.vmem [shape: bf16[196,256], index: 1, kind: input, shape index: {}]   ;;  %s4889_s2 = inlined_call_operand.vmem [shape: bf16[2,512,128], index: 2, kind: input, shape index: {}]   ;;  %s4890_s3 = inlined_call_operand.vmem [shape: f32[1,128], index: 3, kind: input, shape index: {}]   ;;  %s4891_s4 = inlined_call_operand.vmem [shape: bf16[3,384,128], index: 4, kind: input, shape index: {}]   ;;  %s4892_s5 = inlined_call_operand.vmem [shape: f32[1,128], index: 5, kind: input, shape index: {}]   ;;  %s4893_s6 = inlined_call_operand.hbm [shape: f32[2,4,4,128], index: 6, kind: output, shape index: {}]  }
   0x1   :  { %13 = vsyncpa [#allocation7 + $0x1], 0  ;;  %s4002_s21 = smov 0   ;;  %s4004_s22 = smov 0  }
   0x2   :  { %s4006_s23 = smov 0   ;;  %s4008_s24 = smov 0  }
   0x3 LB: > { %s4023_s25 = sadd.s32 4294967295, %s3962_s24   ;;  %s2857_s26 = sadd.s32 4294967294, %s3962_s24   ;;  %s3962_s24 = sphi %s4008_s24, %s4917_s24   ;;  %s3958_s23 = sphi %s4006_s23, %s4916_s23   ;;  %s3954_s22 = sphi %s4004_s22, %s4915_s22   ;;  %s3950_s21 = sphi %s4002_s21, %s4914_s21  }
   0x4   : > { %s4027_s27 = sadd.s32 1, %s3962_s24   ;;  %s157_s28 = sadd.s32 1, %s3958_s23 }
   0x5   : > { %s154_s29 = ssub.s32 %s3962_s24, %s4027_s27  ;;  %p167_p0 = scmp.ne.s32.totalorder %s3958_s23, %s3954_s22 }
   0x6   : > { %p155_p1 = scmp.eq.s32.totalorder %s154_s29, 0  ;;  %p168_p2 = scmp.eq.s32.totalorder %s4023_s25, 1 }
   0x7   : > { %p173_p3 = scmp.ne.s32.totalorder %s3954_s22, %s3950_s21  ;;  %p174_p4 = scmp.eq.s32.totalorder %s2857_s26, 1 }
   0x8   : > { %s4038_s30 = scalar_select %p155_p1, %s3958_s23, %s157_s28  }
   0x9   : > { %p4040_p5 = por %p168_p2, %p167_p0  ;;  %p4044_p6 = por %p174_p4, %p173_p3 }
   0xa   : > { %p2860_p7 = scmp.ge.s32.totalorder %s3962_s24, 1  ;;  %p215_p8 = scmp.lt.s32.totalorder %s3962_s24, 3 }
   0xc   : > { %p216_p9 = pnand %p2860_p7, %p215_p8 }
   0xd   : > { %p245_p10 = scmp.lt.s32.totalorder (!%p216_p9), %s4023_s25, 1  ;;  %s242_s11 = sand.u32 (!%p216_p9), 1, %s3954_s22  }
   0xe   : > { %219 = sbr.rel (%p216_p9) target bundleno = 683 (0x2ab), region = 44  ;;  %s2861_s12 = sshll.u32 (!%p216_p9), %s242_s11, 4 }
   0xf   : > { %s3854_s15 = sshll.u32 (!%p216_p9), %s4023_s25, 4  ;;  %s244_s16 = scalar_lea.vmem (!%p216_p9), [#allocation6], %s2861_s12 }
  0x10   : > { %s2791_s20 = scalar_lea.hbm (!%p216_p9), %s4893_s6, %s3854_s15  ;;  %s3920_s12 = scalar_lea.hbm (!%p216_p9), %s4893_s6, 32 }
  0x11   : > { %s2794_s26 = sshll.u32 (!%p216_p9), %s2791_s20, 4  ;;  %s2795_s26 = int_to_ptr.hbm [resolvable:$true] %s2794_s26 }
  0x13   : > { %v2927_v0 = vld [vmem:[%s4888_s1 + $0x70] sm:$0xf]  ;;  %v3709_v1 = vld [vmem:[%s4888_s1 + $0x74] sm:$0xf0]  ;;  %v3708_v2 = vld [vmem:[%s4888_s1 + $0x74] sm:$0xf] }
  0x14   : > { %v2928_v3 = vor.u32 %v3709_v1, %v2927_v0  ;;  %v2929_v4 = vld [vmem:[%s4888_s1 + $0x78] sm:$0xf0]  ;;  %v2919_v5 = vld [vmem:[%s4888_s1 + $0x60] sm:$0xf]  ;;  %v3707_v6 = vld [vmem:[%s4888_s1 + $0x64] sm:$0xf0] }
  0x15   : > { %v2932_v7 = vor.u32 %v3708_v2, %v2929_v4  ;;  %v3706_v8 = vld [vmem:[%s4888_s1 + $0x64] sm:$0xf]  ;;  %v2921_v9 = vld [vmem:[%s4888_s1 + $0x68] sm:$0xf0]  ;;  %v2920_v11 = vor.u32 %v3707_v6, %v2919_v5  ;;  %vm551_vm0 = vcmask 1041408   ;;  %s246_s19 = scalar_select %p245_p10, %s4023_s25, 1 }
  0x16   : > { %v368_v10 = vld [vmem:[%s4888_s1 + $0xc0] sm:$0x33]  ;;  %558 = vmatpush.bf16.msra.mxu0 %v2928_v3  ;;  %v2924_v14 = vor.u32 %v3706_v8, %v2921_v9  ;;  %v2911_v15 = vld [vmem:[%s4888_s1 + $0x50] sm:$0xf]  ;;  %v3705_v16 = vld [vmem:[%s4888_s1 + $0x54] sm:$0xf0] }
  0x17   : > { %v495_v12 = vunpack.c.h.b16 %v368_v10  ;;  %v494_v13 = vunpack.c.l.b16 %v368_v10  ;;  %596 = vmatpush.bf16.msra.mxu2 %v2932_v7  ;;  %v3704_v17 = vld [vmem:[%s4888_s1 + $0x54] sm:$0xf]  ;;  %v2913_v19 = vld [vmem:[%s4888_s1 + $0x58] sm:$0xf0]  ;;  %v2912_v24 = vor.u32 %v3705_v16, %v2911_v15  ;;  %v2903_v26 = vld [vmem:[%s4888_s1 + $0x40] sm:$0xf] }
  0x18   : > { %v3716_v20 = vld [vmem:[%s4888_s1 + $0xb4] sm:$0xf]  ;;  %v2961_v21 = vld [vmem:[%s4888_s1 + $0xb8] sm:$0xf0]  ;;  %v2959_v27 = vld [vmem:[%s4888_s1 + $0xb0] sm:$0xf]  ;;  %v2916_v28 = vor.u32 %v3704_v17, %v2913_v19 }
  0x19   : > { %v521_v18 = vpack.c.b16 %v495_v12, %v495_v12  ;;  %v520_v22 = vpack.c.b16 %v494_v13, %v494_v13  ;;  %v2964_v29 = vor.u32 %v3716_v20, %v2961_v21  ;;  %v3703_v30 = vld [vmem:[%s4888_s1 + $0x44] sm:$0xf0]  ;;  %v3702_v31 = vld [vmem:[%s4888_s1 + $0x44] sm:$0xf]  ;;  %v3717_v32 = vld [vmem:[%s4888_s1 + $0xb4] sm:$0xf0] }
  0x1a   : > { %559 = vmatpush.bf16.msra.mxu0 %v2920_v11  ;;  %v2905_v33 = vld [vmem:[%s4888_s1 + $0x48] sm:$0xf0]  ;;  %v3714_v34 = vld [vmem:[%s4888_s1 + $0xa4] sm:$0xf]  ;;  %v2960_v36 = vor.u32 %v3717_v32, %v2959_v27  ;;  %v2951_v37 = vld [vmem:[%s4888_s1 + $0xa0] sm:$0xf]  ;;  %v2904_v39 = vor.u32 %v3703_v30, %v2903_v26 }
  0x1b   : > { %v556_v23 = vsel %vm551_vm0, %v521_v18, 0  ;;  %v553_v25 = vsel %vm551_vm0, %v520_v22, 0  ;;  %597 = vmatpush.bf16.msra.mxu2 %v2924_v14  ;;  %v2953_v35 = vld [vmem:[%s4888_s1 + $0xa8] sm:$0xf0]  ;;  %v3715_v38 = vld [vmem:[%s4888_s1 + $0xa4] sm:$0xf0]  ;;  %v2908_v43 = vor.u32 %v3702_v31, %v2905_v33 }
  0x1c   : > { %618 = vmatpush.bf16.msra.mxu3 %v556_v23  ;;  %580 = vmatpush.bf16.msra.mxu1 %v553_v25  ;;  %v2895_v40 = vld [vmem:[%s4888_s1 + $0x30] sm:$0xf]  ;;  %v3701_v41 = vld [vmem:[%s4888_s1 + $0x34] sm:$0xf0]  ;;  %v3700_v42 = vld [vmem:[%s4888_s1 + $0x34] sm:$0xf]  ;;  %v2956_v44 = vor.u32 %v3714_v34, %v2953_v35  ;;  %v2952_v48 = vor.u32 %v3715_v38, %v2951_v37 }
  0x1d   : > { %v2897_v45 = vld [vmem:[%s4888_s1 + $0x38] sm:$0xf0]  ;;  %v3712_v46 = vld [vmem:[%s4888_s1 + $0x94] sm:$0xf]  ;;  %v2887_v49 = vld [vmem:[%s4888_s1 + $0x20] sm:$0xf]  ;;  %v2896_v56 = vor.u32 %v3701_v41, %v2895_v40 }
  0x1e   : > { %560 = vmatpush.bf16.msra.mxu0 %v2912_v24  ;;  %v2945_v47 = vld [vmem:[%s4888_s1 + $0x98] sm:$0xf0]  ;;  %v3699_v50 = vld [vmem:[%s4888_s1 + $0x24] sm:$0xf0]  ;;  %v3698_v51 = vld [vmem:[%s4888_s1 + $0x24] sm:$0xf]  ;;  %v2900_v58 = vor.u32 %v3700_v42, %v2897_v45 }
  0x1f   : > { %598 = vmatpush.bf16.msra.mxu2 %v2916_v28  ;;  %v2889_v52 = vld [vmem:[%s4888_s1 + $0x28] sm:$0xf0]  ;;  %v3710_v53 = vld [vmem:[%s4888_s1 + $0x84] sm:$0xf]  ;;  %v2943_v54 = vld [vmem:[%s4888_s1 + $0x90] sm:$0xf]  ;;  %v2948_v59 = vor.u32 %v3712_v46, %v2945_v47  ;;  %v2888_v3 = vor.u32 %v3699_v50, %v2887_v49 }
  0x20   : > { %619 = vmatpush.bf16.msra.mxu3 %v2964_v29  ;;  %581 = vmatpush.bf16.msra.mxu1 %v2960_v36  ;;  %v3713_v55 = vld [vmem:[%s4888_s1 + $0x94] sm:$0xf0]  ;;  %v2937_v57 = vld [vmem:[%s4888_s1 + $0x88] sm:$0xf0]  ;;  %s3855_s13 = smul.u32 40, %s246_s19  ;;  %vm266_vm1 = vcmask 1040384   ;;  %v2892_v4 = vor.u32 %v3698_v51, %v2889_v52 }
  0x21   : > { %vm275_vm2 = vcmask 1042434   ;;  %v4176_v60 = vld [vmem:[%s4888_s1 + $0x10] sm:$0xf]  ;;  %v4181_v61 = vld [vmem:[%s4888_s1 + $0x14] sm:$0xf0]  ;;  %v2944_v63 = vor.u32 %v3713_v55, %v2943_v54  ;;  %v2940_v5 = vor.u32 %v3710_v53, %v2937_v57  ;;  %vm271_vm3 = vcmask 1041409  }
  0x22   : > { %561 = vmatpush.bf16.msra.mxu0 %v2904_v39  ;;  %v4186_v62 = vld [vmem:[%s4888_s1 + $0x14] sm:$0xf]  ;;  %s4191_s28 = scalar_lea.vmem %s4887_s0, %s3855_s13  ;;  %v4196_v0 = vld [vmem:[%s4888_s1 + $0x18] sm:$0xf0]  ;;  %v2935_v1 = vld [vmem:[%s4888_s1 + $0x80] sm:$0xf]  ;;  %v2880_v12 = vor.u32 %v4181_v61, %v4176_v60 }
  0x23   : > { %599 = vmatpush.bf16.msra.mxu2 %v2908_v43  ;;  %v3711_v2 = vld [vmem:[%s4888_s1 + $0x84] sm:$0xf0]  ;;  %v251_v6 = vld [vmem:[%s4191_s28] sm:$0x77]  ;;  %v253_v8 = vld [vmem:[%s4191_s28 + $0x10] sm:$0x77]  ;;  %v2884_v15 = vor.u32 %v4186_v62, %v4196_v0 }
  0x24   : > { %620 = vmatpush.bf16.msra.mxu3 %v2956_v44  ;;  %582 = vmatpush.bf16.msra.mxu1 %v2952_v48  ;;  %v252_v7 = vld [vmem:[%s4191_s28 + $0x8] sm:$0x77]  ;;  %v254_v9 = vld [vmem:[%s4191_s28 + $0x18] sm:$0x77]  ;;  %v261_v10 = vrot.slane %v251_v6, 3  ;;  %v263_v13 = vrot.slane %v253_v8, 3  ;;  %v2936_v16 = vor.u32 %v3711_v2, %v2935_v1 }
  0x25   : > { %v262_v11 = vrot.slane %v252_v7, 3  ;;  %v264_v14 = vrot.slane %v254_v9, 3  ;;  %v2871_v25 = vld [vmem:[%s4888_s1] sm:$0xf]  ;;  %v3695_v30 = vld [vmem:[%s4888_s1 + $0x4] sm:$0xf0] }
  0x26   : > { %562 = vmatpush.bf16.msra.mxu0 %v2896_v56  ;;  %v269_v17 = vsel %vm266_vm1, %v251_v6, %v261_v10  ;;  %v272_v18 = vsel %vm271_vm3, %v251_v6, %v261_v10  ;;  %v276_v19 = vsel %vm275_vm2, %v251_v6, %v261_v10  ;;  %v291_v28 = vsel %vm266_vm1, %v253_v8, %v263_v13  ;;  %v3694_v31 = vld [vmem:[%s4888_s1 + $0x4] sm:$0xf]  ;;  %v2873_v40 = vld [vmem:[%s4888_s1 + $0x8] sm:$0xf0]  ;;  %s2792_s19 = sshll.u32 %s244_s16, 4  ;;  %s2780_s25 = scalar_lea.sflag [#allocation7], %s242_s11  ;;  %s2793_s19 = int_to_ptr.vmem [resolvable:$true] %s2792_s19 }
  0x27   : > { %600 = vmatpush.bf16.msra.mxu2 %v2900_v58  ;;  %v281_v20 = vsel %vm266_vm1, %v252_v7, %v262_v11  ;;  %v274_v21 = vrot.slane %v272_v18, 1  ;;  %v278_v22 = vrot.slane %v276_v19, 2  ;;  %v283_v23 = vsel %vm271_vm3, %v252_v7, %v262_v11  ;;  %383 = vst [vmem:[#allocation1] ss:$9 sm:$0xff] %v269_v17  ;;  %v255_v36 = vld [vmem:[%s4191_s28 + $0x20] sm:$0x77] }
  0x28   : > { %621 = vmatpush.bf16.msra.mxu3 %v2948_v59  ;;  %583 = vmatpush.bf16.msra.mxu1 %v2944_v63  ;;  %v286_v24 = vsel %vm275_vm2, %v252_v7, %v262_v11  ;;  %v285_v26 = vrot.slane %v283_v23, 1  ;;  %v293_v29 = vsel %vm271_vm3, %v253_v8, %v263_v13  ;;  %v296_v33 = vsel %vm275_vm2, %v253_v8, %v263_v13  ;;  %s3914_s28 = sshra.s32 %s2795_s26, 4  ;;  %s3915_s28 = int_to_ptr.hbm [resolvable:$true] %s3914_s28 }
  0x29   : > { %v288_v27 = vrot.slane %v286_v24, 2  ;;  %v295_v32 = vrot.slane %v293_v29, 1  ;;  %v301_v34 = vsel %vm266_vm1, %v254_v9, %v264_v14  ;;  %v325_v35 = vunpack.i.h.s16 %v281_v20  ;;  %386 = vst [vmem:[#allocation1 + $0x1] ss:$9 sm:$0xff] %v274_v21  ;;  %s3916_s29 = scalar_lea.hbm %s3915_s28, 16  ;;  %p3921_p0 = scmp.lt.s32.totalorder %s3915_s28, %s4893_s6 }
  0x2a   : > { %563 = vmatpush.bf16.msra.mxu0 %v2888_v3  ;;  %v298_v37 = vrot.slane %v296_v33, 2  ;;  %v327_v38 = vunpack.i.h.s16 %v285_v26  ;;  %v2863_v39 = vpack.i.b16 %v281_v20, %v278_v22  ;;  %398 = vst [vmem:[#allocation1 + $0x5] ss:$9 sm:$0xff] %v291_v28  ;;  %v2872_v42 = vor.u32 %v3695_v30, %v2871_v25  ;;  %v3757_v30 = vld [vmem:[%s4889_s2 + $0x138] sm:$0xff]  ;;  %p3917_p11 = scmp.ne.s32.totalorder %s3915_s28, %s3916_s29  ;;  %p3922_p1 = scmp.lt.s32.totalorder %s3920_s12, %s3916_s29 }
  0x2b   : > { %601 = vmatpush.bf16.msra.mxu2 %v2892_v4  ;;  %v2864_v41 = vpack.i.b16 %v285_v26, %v325_v35  ;;  %401 = vst [vmem:[#allocation1 + $0x6] ss:$9 sm:$0xff] %v295_v32  ;;  %v303_v43 = vsel %vm271_vm3, %v254_v9, %v264_v14  ;;  %v265_v46 = vrot.slane %v255_v36, 3  ;;  %v2876_v48 = vor.u32 %v3694_v31, %v2873_v40  ;;  %v3765_v31 = vld [vmem:[%s4889_s2 + $0x178] sm:$0xff]  ;;  %v3752_v40 = vld [vmem:[%s4889_s2 + $0x110] sm:$0xff] }
  0x2c   : > { %622 = vmatpush.bf16.msra.mxu3 %v2940_v5  ;;  %584 = vmatpush.bf16.msra.mxu1 %v2936_v16  ;;  %v2865_v44 = vpack.i.b16 %v288_v27, %v327_v38  ;;  %v2866_v45 = vpack.i.b16 %v301_v34, %v298_v37  ;;  %389 = vst [vmem:[#allocation1 + $0x2] ss:$9 sm:$0xff] %v2863_v39  ;;  %v305_v47 = vrot.slane %v303_v43, 1  ;;  %v335_v50 = vunpack.i.h.s16 %v301_v34  ;;  %v3773_v32 = vld [vmem:[%s4889_s2 + $0x1b8] sm:$0xff]  ;;  %p3918_p12 = pnand %p3917_p11, %p4040_p5  ;;  %p3923_p2 = por %p3922_p1, %p3921_p0 }
  0x2d   : > { %392 = vst [vmem:[#allocation1 + $0x3] ss:$9 sm:$0xff] %v2864_v41  ;;  %v306_v49 = vsel %vm275_vm2, %v254_v9, %v264_v14  ;;  %v316_v52 = vsel %vm275_vm2, %v255_v36, %v265_v46  ;;  %v313_v54 = vsel %vm271_vm3, %v255_v36, %v265_v46  ;;  %vm546_vm4 = vcmask 556032   ;;  %v3781_v34 = vld [vmem:[%s4889_s2 + $0x1f8] sm:$0xff]  ;;  %v3756_v41 = vld [vmem:[%s4889_s2 + $0x130] sm:$0xff] }
  0x2e   : > { %564 = vmatpush.bf16.msra.mxu0 %v2880_v12  ;;  %395 = vst [vmem:[#allocation1 + $0x4] ss:$9 sm:$0xff] %v2865_v44  ;;  %v308_v51 = vrot.slane %v306_v49, 2  ;;  %v337_v53 = vunpack.i.h.s16 %v305_v47  ;;  %v318_v55 = vrot.slane %v316_v52, 2  ;;  %v2867_v56 = vpack.i.b16 %v305_v47, %v335_v50  ;;  %p3919_p13 = pneg %p3918_p12 }
  0x2f   : > { %602 = vmatpush.bf16.msra.mxu2 %v2884_v15  ;;  %404 = vst [vmem:[#allocation1 + $0x7] ss:$9 sm:$0xff] %v2866_v45  ;;  %v311_v60 = vsel %vm266_vm1, %v255_v36, %v265_v46  ;;  %v315_v61 = vrot.slane %v313_v54, 1  ;;  %vm664_vm5 = vcmask 1043459   ;;  %vm783_vm6 = vcmask 1042432   ;;  %v3764_v45 = vld [vmem:[%s4889_s2 + $0x170] sm:$0xff] }
  0x30   : > { %v2868_v57 = vpack.i.b16 %v308_v51, %v337_v53  ;;  %v343_v62 = vunpack.i.l.s16 %v318_v55  ;;  %vm784_vm7 = vsmask.f32 2304  ;;  %vm786_vm8 = vcmask 1046532   ;;  %1322 = vmatpush.bf16.msrb.mxu1 %v3757_v30  ;;  %1336 = vmatpush.bf16.msrb.mxu3 %v3765_v31  ;;  %v3772_v46 = vld [vmem:[%s4889_s2 + $0x1b0] sm:$0xff]  ;;  %p3924_p3 = pnand %p3923_p2, %p3919_p13 }
  0x31   : > { %vm787_vm9 = vsmask.f32 6400  ;;  %vm4262_vm10 = vmand %vm783_vm6, %vm784_vm7  ;;  %v3780_v51 = vld [vmem:[%s4889_s2 + $0x1f0] sm:$0xff]  ;;  %vm863_vm13 = vcmask 1043458   ;;  %vm891_vm14 = vsmask.f32 1280 }
  0x32   : > { %565 = vmatpush.bf16.msra.mxu0 %v2872_v42  ;;  %vm4269_vm11 = vmand %vm786_vm8, %vm787_vm9  ;;  %v790_v55 = vld [vmem:[#allocation2 + $0x8] sm:$0x77]  ;;  %vm892_vm15 = vsmask.f32 3336  ;;  %vm896_vm7 = vsmask.f32 7448 }
  0x33   : > { %603 = vmatpush.bf16.msra.mxu2 %v2876_v48  ;;  %vm4290_vm12 = vmor %vm4269_vm11, %vm4262_vm10  ;;  %vm1719_vm9 = vsmask.f32 2306 }
  0x34   : > { %1323 = vmatpush.bf16.msrb.mxu1 %v3756_v41  ;;  %1337 = vmatpush.bf16.msrb.mxu3 %v3764_v45  ;;  %v3760_v41 = vld [vmem:[%s4889_s2 + $0x150] sm:$0xff]  ;;  %vm4569_vm10 = vmand %vm783_vm6, %vm1719_vm9  ;;  %vm1952_vm6 = vcmask 1044484  }
  0x35   : > { %vm4617_vm11 = vmor %vm266_vm1, %vm275_vm2 }
  0x36   : > { %v406_v58 = vld [vmem:[#allocation1 + $0x9] sm:$0xff]  ;;  %v405_v59 = vld [vmem:[#allocation1] sm:$0xff]  ;;  %1350 = vmatpush.bf16.msrb.mxu0 %v3773_v32 }
  0x37   : > { %2967 = vmatmul.msk.bf16.vlgmr.msra.gmra.mxu3 %vm546_vm4, %v406_v58  ;;  %2965 = vmatmul.msk.bf16.vlgmr.msra.gmra.mxu1 %vm546_vm4, %v406_v58  ;;  %408 = vst [vmem:[#allocation1] ss:$9 sm:$0xff] %v2867_v56  ;;  %v793_v32 = vld [vmem:[#allocation2] sm:$0x77] }
  0x38   : > { %566 = vmatmul.bf16.vlgmr.msra.gmra.mxu0 %v405_v59  ;;  %604 = vmatmul.bf16.vlgmr.msra.gmra.mxu2 %v405_v59  ;;  %410 = vst [vmem:[#allocation1 + $0x1] ss:$9 sm:$0xff] %v2868_v57  ;;  %v3755_v59 = vld [vmem:[%s4889_s2 + $0x128] sm:$0xff] }
  0x39   : > { %412 = vst [vmem:[#allocation1 + $0x2] ss:$9 sm:$0xff] %v311_v60  ;;  %1364 = vmatpush.bf16.msrb.mxu2 %v3781_v34  ;;  %v3763_v60 = vld [vmem:[%s4889_s2 + $0x168] sm:$0xff]  ;;  %1324 = vmatpush.bf16.msrb.mxu1 %v3755_v59 }
  0x3a   : > { %414 = vst [vmem:[#allocation1 + $0x3] ss:$9 sm:$0xff] %v315_v61  ;;  %1351 = vmatpush.bf16.msrb.mxu0 %v3772_v46  ;;  %1338 = vmatpush.bf16.msrb.mxu3 %v3763_v60  ;;  %v3767_v59 = vld [vmem:[%s4889_s2 + $0x188] sm:$0xff] }
  0x3b   : > { %416 = vst [vmem:[#allocation1 + $0x4] ss:$9 sm:$0xff] %v343_v62 }
  0x3d   : > { %1365 = vmatpush.bf16.msrb.mxu2 %v3780_v51 }
  0x42   : > { %v418_v63 = vld [vmem:[#allocation1 + $0x9] sm:$0xff]  ;;  %v417_v0 = vld [vmem:[#allocation1] sm:$0xff] }
  0x47   : > { %2968 = vmatmul.msk.bf16.gmra.mxu3 %vm546_vm4, %v418_v63  ;;  %2966 = vmatmul.msk.bf16.gmra.mxu1 %vm546_vm4, %v418_v63  ;;  %vm894_vm4 = vsmask.f32 5392 }
  0x48   : > { %571 = vmatmul.bf16.gmra.mxu0 %v417_v0  ;;  %609 = vmatmul.bf16.gmra.mxu2 %v417_v0 }
  0xb4   : > { %v586_v1 = vpop.f32.mrf.mxu1 }
  0xb5   : > { %v567_v2 = vpop.f32.mrf.mxu0 }
  0xb6   : > { %v587_v3 = vadd.f32 %v586_v1, %v567_v2  ;;  %v3771_v2 = vld [vmem:[%s4889_s2 + $0x1a8] sm:$0xff] }
  0xb7   : > { %1352 = vmatpush.bf16.msrb.mxu0 %v3771_v2 }
  0xb8   : > { %v634_v6 = vmax.f32 %v587_v3, 0.0  ;;  %v3779_v3 = vld [vmem:[%s4889_s2 + $0x1e8] sm:$0xff] }
  0xb9   : > { %1366 = vmatpush.bf16.msrb.mxu2 %v3779_v3  ;;  %v799_v3 = vld [vmem:[#allocation2 + $0x10] sm:$0x77] }
  0xba   : > { %v624_v4 = vpop.f32.mrf.mxu3 }
  0xbb   : > { %v605_v5 = vpop.f32.mrf.mxu2 }
  0xbc   : > { %v625_v7 = vadd.f32 %v624_v4, %v605_v5  ;;  %v588_v8 = vpop.f32.mrf.mxu1 }
  0xbd   : > { %v569_v9 = vpop.f32.mrf.mxu0 }
  0xbe   : > { %v635_v10 = vmax.f32 %v625_v7, 0.0  ;;  %v589_v14 = vadd.f32 %v588_v8, %v569_v9 }
  0xc0   : > { %v642_v11 = vpack.c.bf16 %v635_v10, %v634_v6  ;;  %v636_v24 = vmax.f32 %v589_v14, 0.0 }
  0xc2   : > { %v650_v12 = vrot.slane %v642_v11, 3  ;;  %v626_v13 = vpop.f32.mrf.mxu3 }
  0xc3   : > { %v607_v15 = vpop.f32.mrf.mxu2 }
  0xc4   : > { %v656_v16 = vsel %vm266_vm1, %v642_v11, %v650_v12  ;;  %v658_v17 = vsel %vm271_vm3, %v642_v11, %v650_v12  ;;  %v661_v18 = vsel %vm275_vm2, %v642_v11, %v650_v12  ;;  %v665_v19 = vsel %vm664_vm5, %v642_v11, %v650_v12  ;;  %v591_v28 = vpop.f32.mrf.mxu1  ;;  %v3754_v11 = vld [vmem:[%s4889_s2 + $0x120] sm:$0xff] }
  0xc5   : > { %v660_v20 = vrot.slane %v658_v17, 1  ;;  %v663_v21 = vrot.slane %v661_v18, 2  ;;  %739 = vst [vmem:[#allocation1] ss:$4 sm:$0xff] %v656_v16  ;;  %v627_v22 = vadd.f32 %v626_v13, %v607_v15  ;;  %v667_v23 = vrot.slane %v665_v19, 3  ;;  %v572_v25 = vpop.f32.mrf.mxu0  ;;  %v3762_v12 = vld [vmem:[%s4889_s2 + $0x160] sm:$0xff]  ;;  %1325 = vmatpush.bf16.msrb.mxu1 %v3754_v11 }
  0xc6   : > { %v592_v33 = vadd.f32 %v591_v28, %v572_v25  ;;  %v3770_v13 = vld [vmem:[%s4889_s2 + $0x1a0] sm:$0xff]  ;;  %1339 = vmatpush.bf16.msrb.mxu3 %v3762_v12  ;;  %v3753_v25 = vld [vmem:[%s4889_s2 + $0x118] sm:$0xff] }
  0xc7   : > { %v702_v26 = vunpack.i.l.s16 %v663_v21  ;;  %v703_v27 = vunpack.i.h.s16 %v663_v21  ;;  %742 = vst [vmem:[#allocation1 + $0x1] ss:$4 sm:$0xff] %v660_v20  ;;  %v637_v29 = vmax.f32 %v627_v22, 0.0  ;;  %v705_v52 = vunpack.i.h.s16 %v667_v23  ;;  %v3778_v15 = vld [vmem:[%s4889_s2 + $0x1e0] sm:$0xff]  ;;  %1353 = vmatpush.bf16.msrb.mxu0 %v3770_v13  ;;  %v3725_v11 = vld [vmem:[%s4889_s2 + $0x38] sm:$0xff] }
  0xc8   : > { %v638_v42 = vmax.f32 %v592_v33, 0.0  ;;  %1367 = vmatpush.bf16.msrb.mxu2 %v3778_v15  ;;  %v796_v33 = vld [vmem:[#allocation2 + $0x20] sm:$0x77]  ;;  %v3733_v12 = vld [vmem:[%s4889_s2 + $0x78] sm:$0xff] }
  0xc9   : > { %v2969_v35 = vpack.i.b16 %v667_v23, %v703_v27  ;;  %745 = vst [vmem:[#allocation1 + $0x2] ss:$4 sm:$0xff] %v702_v26  ;;  %v643_v36 = vpack.c.bf16 %v637_v29, %v636_v24  ;;  %v3761_v26 = vld [vmem:[%s4889_s2 + $0x158] sm:$0xff]  ;;  %1326 = vmatpush.bf16.msrb.mxu1 %v3753_v25 }
  0xca   : > { %v629_v37 = vpop.f32.mrf.mxu3  ;;  %v3769_v27 = vld [vmem:[%s4889_s2 + $0x198] sm:$0xff]  ;;  %1340 = vmatpush.bf16.msrb.mxu3 %v3761_v26 }
  0xcb   : > { %749 = vst [vmem:[#allocation1 + $0x20] ss:$4 sm:$0xff] %v2969_v35  ;;  %v651_v38 = vrot.slane %v643_v36, 3  ;;  %v610_v39 = vpop.f32.mrf.mxu2  ;;  %v3777_v29 = vld [vmem:[%s4889_s2 + $0x1d8] sm:$0xff]  ;;  %1354 = vmatpush.bf16.msrb.mxu0 %v3769_v27 }
  0xcc   : > { %v630_v43 = vadd.f32 %v629_v37, %v610_v39  ;;  %v593_v5 = vpop.f32.mrf.mxu1  ;;  %1368 = vmatpush.bf16.msrb.mxu2 %v3777_v29  ;;  %v3740_v29 = vld [vmem:[%s4889_s2 + $0xb0] sm:$0xff] }
  0xcd   : > { %v670_v47 = vsel %vm266_vm1, %v643_v36, %v651_v38  ;;  %v672_v48 = vsel %vm271_vm3, %v643_v36, %v651_v38  ;;  %v675_v49 = vsel %vm275_vm2, %v643_v36, %v651_v38  ;;  %v678_v50 = vsel %vm664_vm5, %v643_v36, %v651_v38  ;;  %v574_v1 = vpop.f32.mrf.mxu0  ;;  %1327 = vmatpush.bf16.msrb.mxu1 %v3752_v40  ;;  %v3723_v40 = vld [vmem:[%s4889_s2 + $0x28] sm:$0xff] }
  0xce   : > { %v680_v53 = vrot.slane %v678_v50, 3  ;;  %v707_v54 = vunpack.i.h.s16 %v670_v47  ;;  %v674_v56 = vrot.slane %v672_v48, 1  ;;  %v639_v57 = vmax.f32 %v630_v43, 0.0  ;;  %v3768_v48 = vld [vmem:[%s4889_s2 + $0x190] sm:$0xff]  ;;  %1341 = vmatpush.bf16.msrb.mxu3 %v3760_v41  ;;  %v3731_v41 = vld [vmem:[%s4889_s2 + $0x68] sm:$0xff] }
  0xcf   : > { %v677_v61 = vrot.slane %v675_v49, 2  ;;  %v2970_v63 = vpack.i.b16 %v670_v47, %v705_v52  ;;  %v594_v9 = vadd.f32 %v593_v5, %v574_v1  ;;  %v3776_v49 = vld [vmem:[%s4889_s2 + $0x1d0] sm:$0xff]  ;;  %1355 = vmatpush.bf16.msrb.mxu0 %v3768_v48  ;;  %v3758_v5 = vld [vmem:[%s4889_s2 + $0x140] sm:$0xff] }
  0xd0   : > { %v712_v62 = vunpack.i.l.s16 %v680_v53  ;;  %v746_v0 = vld [vmem:[#allocation1] sm:$0xff]  ;;  %755 = vst [vmem:[#allocation1 + $0x22] ss:$4 sm:$0xff] %v707_v54  ;;  %v644_v4 = vpack.c.bf16 %v639_v57, %v638_v42  ;;  %v713_v18 = vunpack.i.h.s16 %v680_v53  ;;  %1369 = vmatpush.bf16.msrb.mxu2 %v3776_v49  ;;  %v3759_v57 = vld [vmem:[%s4889_s2 + $0x148] sm:$0xff] }
  0xd1   : > { %758 = vst [vmem:[#allocation1] ss:$4 sm:$0xff] %v674_v56  ;;  %v791_v6 = vsel %vm4290_vm12, %v746_v0, %v790_v55  ;;  %v640_v23 = vmax.f32 %v594_v9, 0.0  ;;  %v3751_v56 = vld [vmem:[%s4889_s2 + $0x108] sm:$0xff]  ;;  %v3774_v9 = vld [vmem:[%s4889_s2 + $0x1c0] sm:$0xff] }
  0xd2   : > { %760 = vst [vmem:[#allocation1 + $0x1] ss:$4 sm:$0xff] %v677_v61  ;;  %v652_v7 = vrot.slane %v644_v4, 3  ;;  %v631_v8 = vpop.f32.mrf.mxu3  ;;  %1328 = vmatpush.bf16.msrb.mxu1 %v3751_v56  ;;  %1342 = vmatpush.bf16.msrb.mxu3 %v3759_v57  ;;  %v3739_v49 = vld [vmem:[%s4889_s2 + $0xa8] sm:$0xff] }
  0xd3   : > { %762 = vst [vmem:[#allocation1 + $0x2] ss:$4 sm:$0xff] %v712_v62  ;;  %v612_v10 = vpop.f32.mrf.mxu2  ;;  %1356 = vmatpush.bf16.msrb.mxu0 %v3767_v59 }
  0xd4   : > { %752 = vst [vmem:[#allocation1 + $0x21] ss:$4 sm:$0xff] %v2970_v63  ;;  %v632_v14 = vadd.f32 %v631_v8, %v612_v10  ;;  %v683_v16 = vsel %vm266_vm1, %v644_v4, %v652_v7  ;;  %v685_v17 = vsel %vm271_vm3, %v644_v4, %v652_v7  ;;  %v688_v20 = vsel %vm275_vm2, %v644_v4, %v652_v7  ;;  %vm4355_vm3 = vmor %vm891_vm14, %vm892_vm15  ;;  %v3775_v63 = vld [vmem:[%s4889_s2 + $0x1c8] sm:$0xff]  ;;  %v3766_v8 = vld [vmem:[%s4889_s2 + $0x180] sm:$0xff] }
  0xd5   : > { %792 = vst [vmem:[#allocation2 + $0x8] sm:$0x77] %v791_v6  ;;  %v687_v19 = vrot.slane %v685_v17, 1  ;;  %v715_v21 = vunpack.i.h.s16 %v683_v16  ;;  %v691_v22 = vsel %vm664_vm5, %v644_v4, %v652_v7  ;;  %v2971_v28 = vpack.i.b16 %v683_v16, %v713_v18  ;;  %vm895_vm5 = vmor %vm4355_vm3, %vm894_vm4  ;;  %1370 = vmatpush.bf16.msrb.mxu2 %v3775_v63  ;;  %v3750_v4 = vld [vmem:[%s4889_s2 + $0x100] sm:$0xff]  ;;  %v3741_v16 = vld [vmem:[%s4889_s2 + $0xb8] sm:$0xff] }
  0xd6   : > { %v641_v24 = vmax.f32 %v632_v14, 0.0  ;;  %v690_v30 = vrot.slane %v688_v20, 2  ;;  %v693_v36 = vrot.slane %v691_v22, 3  ;;  %vm4383_vm8 = vmor %vm895_vm5, %vm896_vm7  ;;  %1329 = vmatpush.bf16.msrb.mxu1 %v3750_v4  ;;  %1343 = vmatpush.bf16.msrb.mxu3 %v3758_v5  ;;  %v3749_v17 = vld [vmem:[%s4889_s2 + $0xf8] sm:$0xff]  ;;  %v3724_v18 = vld [vmem:[%s4889_s2 + $0x30] sm:$0xff] }
  0xd7   : > { %v2972_v31 = vpack.i.b16 %v687_v19, %v715_v21  ;;  %v717_v37 = vunpack.i.h.s16 %v687_v19  ;;  %1357 = vmatpush.bf16.msrb.mxu0 %v3766_v8  ;;  %vm4635_vm2 = vmor %vm4617_vm11, %vm1952_vm6  ;;  %v3790_v6 = vld [vmem:[%s4891_s4 + $0x40] sm:$0xff] }
  0xd8   : > { %v645_v34 = vpack.c.bf16 %v641_v24, %v640_v23 }
  0xd9   : > { %1371 = vmatpush.bf16.msrb.mxu2 %v3774_v9 }
  0xda   : > { %v763_v35 = vld [vmem:[#allocation1] sm:$0xff]  ;;  %v653_v39 = vrot.slane %v645_v34, 3  ;;  %1589 = vmatpush.bf16.msra.mxu1 %v3725_v11  ;;  %1603 = vmatpush.bf16.msra.mxu3 %v3733_v12 }
  0xdb   : > { %v756_v38 = vld [vmem:[#allocation1 + $0x20] sm:$0xff]  ;;  %772 = vst [vmem:[#allocation1] ss:$4 sm:$0xff] %v690_v30  ;;  %v797_v50 = vsel %vm4290_vm12, %v763_v35, %v796_v33  ;;  %1617 = vmatpush.bf16.msra.mxu0 %v3741_v16  ;;  %v3748_v35 = vld [vmem:[%s4889_s2 + $0xf0] sm:$0xff] }
  0xdc   : > { %765 = vst [vmem:[#allocation1 + $0x20] ss:$4 sm:$0xff] %v2971_v28  ;;  %v805_v42 = vld [vmem:[#allocation2 + $0x8] sm:$0x33]  ;;  %v794_v44 = vsel %vm4290_vm12, %v756_v38, %v793_v32  ;;  %v696_v47 = vsel %vm266_vm1, %v645_v34, %v653_v39  ;;  %v802_v34 = vld [vmem:[#allocation2 + $0x18] sm:$0x77] }
  0xdd   : > { %v845_v43 = vld [vmem:[#allocation2 + $0x8] sm:$0x77]  ;;  %767 = vst [vmem:[#allocation1 + $0x21] ss:$4 sm:$0xff] %v2972_v31  ;;  %v815_v45 = vrot.slane %v805_v42, 2  ;;  %v722_v52 = vunpack.i.l.s16 %v696_v47  ;;  %1631 = vmatpush.bf16.msra.mxu2 %v3749_v17  ;;  %vm1954_vm1 = vcmask 1046534  }
  0xde   : > { %v855_v46 = vrot.slane %v845_v43, 2  ;;  %769 = vst [vmem:[#allocation1 + $0x22] ss:$4 sm:$0xff] %v717_v37  ;;  %v3732_v28 = vld [vmem:[%s4889_s2 + $0x70] sm:$0xff]  ;;  %1590 = vmatpush.bf16.msra.mxu1 %v3724_v18 }
  0xdf   : > { %774 = vst [vmem:[#allocation1 + $0x1] ss:$4 sm:$0xff] %v693_v36  ;;  %v822_v53 = vsel %vm551_vm0, %v805_v42, %v815_v45  ;;  %1604 = vmatpush.bf16.msra.mxu3 %v3732_v28  ;;  %1618 = vmatpush.bf16.msra.mxu0 %v3740_v29  ;;  %v3720_v28 = vld [vmem:[%s4889_s2 + $0x10] sm:$0xff] }
  0xe0   : > { %v862_v54 = vsel %vm551_vm0, %v845_v43, %v855_v46  ;;  %v864_v55 = vsel %vm863_vm13, %v845_v43, %v855_v46  ;;  %795 = vst [vmem:[#allocation2] sm:$0x77] %v794_v44 }
  0xe1   : > { %v866_v60 = vrot.slane %v864_v55, 2  ;;  %v898_v61 = vshrl.u32 %v862_v54, 16  ;;  %v901_v62 = vshll.u32 %v862_v54, 16  ;;  %798 = vst [vmem:[#allocation2 + $0x20] sm:$0x77] %v797_v50  ;;  %1632 = vmatpush.bf16.msra.mxu2 %v3748_v35  ;;  %v3747_v50 = vld [vmem:[%s4889_s2 + $0xe8] sm:$0xff] }
  0xe2   : > { %840 = vst [vmem:[#allocation3] sm:$0xf] %v822_v53  ;;  %1591 = vmatpush.bf16.msra.mxu1 %v3723_v40  ;;  %v3719_v40 = vld [vmem:[%s4889_s2 + $0x8] sm:$0xff] }
  0xe3   : > { %v900_v0 = vrot.slane %v898_v61, 6  ;;  %v903_v1 = vrot.slane %v901_v62, 7  ;;  %v907_v2 = vshll.u32 %v866_v60, 16  ;;  %776 = vst [vmem:[#allocation1 + $0x2] ss:$4 sm:$0xff] %v722_v52  ;;  %1605 = vmatpush.bf16.msra.mxu3 %v3731_v41  ;;  %v3722_v61 = vld [vmem:[%s4889_s2 + $0x20] sm:$0xff]  ;;  %1619 = vmatpush.bf16.msra.mxu0 %v3739_v49 }
  0xe4   : > { %v3730_v62 = vld [vmem:[%s4889_s2 + $0x60] sm:$0xff]  ;;  %v3743_v49 = vld [vmem:[%s4889_s2 + $0xc8] sm:$0xff] }
  0xe5   : > { %v904_v7 = vor.u32 %v903_v1, %v900_v0  ;;  %v770_v10 = vld [vmem:[#allocation1 + $0x20] sm:$0xff]  ;;  %v909_v15 = vrot.slane %v907_v2, 7  ;;  %1633 = vmatpush.bf16.msra.mxu2 %v3747_v50 }
  0xe6   : > { %v800_v13 = vsel %vm4290_vm12, %v770_v10, %v799_v3  ;;  %v3738_v2 = vld [vmem:[%s4889_s2 + $0xa0] sm:$0xff]  ;;  %1592 = vmatpush.bf16.msra.mxu1 %v3722_v61 }
  0xe7   : > { %v905_v14 = vrot.slane %v904_v7, 2  ;;  %801 = vst [vmem:[#allocation2 + $0x10] sm:$0x77] %v800_v13  ;;  %v806_v19 = vld [vmem:[#allocation2] sm:$0x33]  ;;  %v3746_v3 = vld [vmem:[%s4889_s2 + $0xe0] sm:$0xff]  ;;  %1606 = vmatpush.bf16.msra.mxu3 %v3730_v62  ;;  %1620 = vmatpush.bf16.msra.mxu0 %v3738_v2 }
  0xe8   : > { %v846_v20 = vld [vmem:[#allocation2] sm:$0x77]  ;;  %v816_v22 = vrot.slane %v806_v19, 2 }
  0xe9   : > { %v807_v21 = vld [vmem:[#allocation2 + $0x20] sm:$0x33]  ;;  %v856_v24 = vrot.slane %v846_v20, 2  ;;  %v910_v25 = vsel %vm4383_vm8, %v905_v14, %v909_v15  ;;  %1634 = vmatpush.bf16.msra.mxu2 %v3746_v3 }
  0xea   : > { %v847_v23 = vld [vmem:[#allocation2 + $0x20] sm:$0x77]  ;;  %v817_v26 = vrot.slane %v807_v21, 2  ;;  %968 = vst [vmem:[#allocation3 + $0x4] sm:$0xf] %v910_v25  ;;  %v825_v30 = vsel %vm551_vm0, %v806_v19, %v816_v22  ;;  %v777_v33 = vld [vmem:[#allocation1] sm:$0xff] }
  0xeb   : > { %v857_v27 = vrot.slane %v847_v23, 2  ;;  %v869_v31 = vsel %vm551_vm0, %v846_v20, %v856_v24  ;;  %v870_v32 = vsel %vm863_vm13, %v846_v20, %v856_v24  ;;  %841 = vst [vmem:[#allocation3 + $0x8] sm:$0xf] %v825_v30  ;;  %v803_v48 = vsel %vm4290_vm12, %v777_v33, %v802_v34  ;;  %v3721_v20 = vld [vmem:[%s4889_s2 + $0x18] sm:$0xff]  ;;  %v3728_v33 = vld [vmem:[%s4889_s2 + $0x50] sm:$0xff]  ;;  %vm4654_vm12 = vmor %vm4635_vm2, %vm1954_vm1 }
  0xec   : > { %v828_v36 = vsel %vm551_vm0, %v807_v21, %v817_v26  ;;  %v872_v37 = vrot.slane %v870_v32, 2  ;;  %v911_v43 = vshrl.u32 %v869_v31, 16  ;;  %v914_v44 = vshll.u32 %v869_v31, 16  ;;  %804 = vst [vmem:[#allocation2 + $0x18] sm:$0x77] %v803_v48  ;;  %v3729_v24 = vld [vmem:[%s4889_s2 + $0x58] sm:$0xff]  ;;  %1593 = vmatpush.bf16.msra.mxu1 %v3721_v20 }
  0xed   : > { %v875_v38 = vsel %vm551_vm0, %v847_v23, %v857_v27  ;;  %v876_v39 = vsel %vm863_vm13, %v847_v23, %v857_v27  ;;  %842 = vst [vmem:[#allocation3 + $0x10] sm:$0xf] %v828_v36  ;;  %v3737_v25 = vld [vmem:[%s4889_s2 + $0x98] sm:$0xff]  ;;  %1607 = vmatpush.bf16.msra.mxu3 %v3729_v24  ;;  %v3736_v34 = vld [vmem:[%s4889_s2 + $0x90] sm:$0xff] }
  0xee   : > { %v878_v42 = vrot.slane %v876_v39, 2  ;;  %v924_v45 = vshrl.u32 %v875_v38, 16  ;;  %v920_v46 = vshll.u32 %v872_v37, 16  ;;  %v927_v47 = vshll.u32 %v875_v38, 16  ;;  %v808_v51 = vld [vmem:[#allocation2 + $0x10] sm:$0x33]  ;;  %1621 = vmatpush.bf16.msra.mxu0 %v3737_v25 }
  0xef   : > { %v848_v52 = vld [vmem:[#allocation2 + $0x10] sm:$0x77]  ;;  %v913_v53 = vrot.slane %v911_v43, 6  ;;  %v916_v54 = vrot.slane %v914_v44, 7  ;;  %v818_v55 = vrot.slane %v808_v51, 2  ;;  %v3744_v38 = vld [vmem:[%s4889_s2 + $0xd0] sm:$0xff] }
  0xf0   : > { %v858_v56 = vrot.slane %v848_v52, 2  ;;  %v926_v57 = vrot.slane %v924_v45, 6  ;;  %v929_v59 = vrot.slane %v927_v47, 7  ;;  %v933_v60 = vshll.u32 %v878_v42, 16  ;;  %v3745_v27 = vld [vmem:[%s4889_s2 + $0xd8] sm:$0xff]  ;;  %1594 = vmatpush.bf16.msra.mxu1 %v3720_v28  ;;  %v3727_v45 = vld [vmem:[%s4889_s2 + $0x48] sm:$0xff] }
  0xf1   : > { %v917_v58 = vor.u32 %v916_v54, %v913_v53  ;;  %v831_v63 = vsel %vm551_vm0, %v808_v51, %v818_v55  ;;  %v922_v7 = vrot.slane %v920_v46, 7  ;;  %1635 = vmatpush.bf16.msra.mxu2 %v3745_v27  ;;  %1608 = vmatpush.bf16.msra.mxu3 %v3728_v33  ;;  %v3735_v46 = vld [vmem:[%s4889_s2 + $0x88] sm:$0xff]  ;;  %v3726_v53 = vld [vmem:[%s4889_s2 + $0x40] sm:$0xff]  ;;  %v3813_v24 = vld [vmem:[%s4891_s4 + $0xf8] sm:$0xff] }
  0xf2   : > { %v881_v0 = vsel %vm551_vm0, %v848_v52, %v858_v56  ;;  %v882_v1 = vsel %vm863_vm13, %v848_v52, %v858_v56  ;;  %843 = vst [vmem:[#allocation3 + $0x18] sm:$0xf] %v831_v63  ;;  %v930_v8 = vor.u32 %v929_v59, %v926_v57  ;;  %v935_v13 = vrot.slane %v933_v60, 7  ;;  %1622 = vmatpush.bf16.msra.mxu0 %v3736_v34  ;;  %v3718_v52 = vld [vmem:[%s4889_s2] sm:$0xff]  ;;  %v973_v59 = vld [vmem:[#allocation3] sm:$0xff] }
  0xf3   : > { %v884_v4 = vrot.slane %v882_v1, 2  ;;  %v918_v5 = vrot.slane %v917_v58, 2  ;;  %v937_v9 = vshrl.u32 %v881_v0, 16  ;;  %v940_v10 = vshll.u32 %v881_v0, 16  ;;  %v809_v18 = vld [vmem:[#allocation2 + $0x18] sm:$0x33] }
  0xf4   : > { %v931_v12 = vrot.slane %v930_v8, 2  ;;  %v849_v19 = vld [vmem:[#allocation2 + $0x18] sm:$0x77]  ;;  %v819_v22 = vrot.slane %v809_v18, 2  ;;  %1595 = vmatpush.bf16.msra.mxu1 %v3719_v40 }
  0xf5   : > { %v923_v11 = vsel %vm4383_vm8, %v918_v5, %v922_v7  ;;  %v946_v14 = vshll.u32 %v884_v4, 16  ;;  %v939_v15 = vrot.slane %v937_v9, 6  ;;  %v942_v16 = vrot.slane %v940_v10, 7  ;;  %1636 = vmatpush.bf16.msra.mxu2 %v3744_v38  ;;  %1609 = vmatpush.bf16.msra.mxu3 %v3727_v45  ;;  %v3734_v54 = vld [vmem:[%s4889_s2 + $0x80] sm:$0xff]  ;;  %v3811_v38 = vld [vmem:[%s4891_s4 + $0xe8] sm:$0xff] }
  0xf6   : > { %969 = vst [vmem:[#allocation3 + $0xc] sm:$0xf] %v923_v11  ;;  %v936_v17 = vsel %vm4383_vm8, %v931_v12, %v935_v13  ;;  %v859_v23 = vrot.slane %v849_v19, 2  ;;  %v834_v30 = vsel %vm551_vm0, %v809_v18, %v819_v22  ;;  %1623 = vmatpush.bf16.msra.mxu0 %v3735_v46  ;;  %v3742_v56 = vld [vmem:[%s4889_s2 + $0xc0] sm:$0xff]  ;;  %v3821_v46 = vld [vmem:[%s4891_s4 + $0x138] sm:$0xff] }
  0xf7   : > { %v943_v21 = vor.u32 %v942_v16, %v939_v15  ;;  %970 = vst [vmem:[#allocation3 + $0x14] sm:$0xf] %v936_v17  ;;  %v948_v26 = vrot.slane %v946_v14, 7  ;;  %v3964_v16 = vmov 0   ;;  %v3898_v27 = vld [vmem:[%s4890_s3] ss:$0 sm:$0xff] }
  0xf8   : > { %v887_v31 = vsel %vm551_vm0, %v849_v19, %v859_v23  ;;  %v888_v32 = vsel %vm863_vm13, %v849_v19, %v859_v23  ;;  %844 = vst [vmem:[#allocation3 + $0x20] sm:$0xf] %v834_v30  ;;  %1596 = vmatpush.bf16.msra.mxu1 %v3718_v52  ;;  %v3810_v45 = vld [vmem:[%s4891_s4 + $0xe0] sm:$0xff] }
  0xf9   : > { %v944_v29 = vrot.slane %v943_v21, 2  ;;  %v890_v35 = vrot.slane %v888_v32, 2  ;;  %v950_v36 = vshrl.u32 %v887_v31, 16  ;;  %v953_v37 = vshll.u32 %v887_v31, 16  ;;  %1637 = vmatpush.bf16.msra.mxu2 %v3743_v49  ;;  %1610 = vmatpush.bf16.msra.mxu3 %v3726_v53  ;;  %1655 = vst [vmem:[#allocation4] sm:$0x7] %v3964_v16 }
  0xfa   : > { %1624 = vmatpush.bf16.msra.mxu0 %v3734_v54  ;;  %1656 = vst [vmem:[#allocation4 + $0x4] sm:$0x7] %v3964_v16  ;;  %v3812_v31 = vld [vmem:[%s4891_s4 + $0xf0] sm:$0xff] }
  0xfb   : > { %v949_v39 = vsel %vm4383_vm8, %v944_v29, %v948_v26  ;;  %v952_v42 = vrot.slane %v950_v36, 6  ;;  %v955_v43 = vrot.slane %v953_v37, 7  ;;  %v959_v44 = vshll.u32 %v890_v35, 16  ;;  %1657 = vst [vmem:[#allocation4 + $0x8] sm:$0x7] %v3964_v16 }
  0xfc   : > { %971 = vst [vmem:[#allocation3 + $0x1c] sm:$0xf] %v949_v39 }
  0xfd   : > { %v974_v41 = vld [vmem:[#allocation3 + $0x8] sm:$0xff]  ;;  %v956_v48 = vor.u32 %v955_v43, %v952_v42  ;;  %v961_v51 = vrot.slane %v959_v44, 7  ;;  %1638 = vmatpush.bf16.msra.mxu2 %v3742_v56  ;;  %1658 = vst [vmem:[#allocation4 + $0xc] sm:$0x7] %v3964_v16 }
  0xfe   : > { %1112 = vst [vmem:[#allocation1] ss:$4 sm:$0xff] %v974_v41  ;;  %v975_v47 = vld [vmem:[#allocation3 + $0x10] sm:$0xff] }
  0xff   : > { %1115 = vst [vmem:[#allocation1 + $0x1] ss:$4 sm:$0xff] %v975_v47  ;;  %v957_v50 = vrot.slane %v956_v48, 2 }
 0x100   : > { %1659 = vst [vmem:[#allocation4 + $0x10] sm:$0x7] %v3964_v16  ;;  %v1733_v37 = vld [vmem:[#allocation4] sm:$0x3] }
 0x101   : > { %v962_v55 = vsel %vm4383_vm8, %v957_v50, %v961_v51  ;;  %1660 = vst [vmem:[#allocation4 + $0x14] sm:$0x7] %v3964_v16  ;;  %v1745_v54 = vld [vmem:[#allocation4] sm:$0x7] }
 0x102   : > { %972 = vst [vmem:[#allocation3 + $0x24] sm:$0xf] %v962_v55  ;;  %v3809_v55 = vld [vmem:[%s4891_s4 + $0xd8] sm:$0xff] }
 0x103   : > { %v976_v57 = vld [vmem:[#allocation3 + $0x18] sm:$0xff]  ;;  %1739 = vst [vmem:[#allocation5] sm:$0x3] %v1733_v37 }
 0x104   : > { %1118 = vst [vmem:[#allocation1 + $0x2] ss:$4 sm:$0xff] %v976_v57 }
 0x108   : > { %v1738_v52 = vld [vmem:[#allocation4 + $0x14] sm:$0x3] }
 0x109   : > { %v1045_v58 = vld [vmem:[#allocation3 + $0x20] sm:$0xff]  ;;  %1744 = vst [vmem:[#allocation5 + $0x1e] sm:$0x3] %v1738_v52  ;;  %v1750_v56 = vld [vmem:[#allocation4 + $0x14] sm:$0x7]  ;;  %v3825_v52 = vld [vmem:[%s4891_s4 + $0x158] sm:$0xff] }
 0x10a   : > { %1121 = vst [vmem:[#allocation1 + $0x3] ss:$4 sm:$0xff] %v1045_v58  ;;  %v3820_v58 = vld [vmem:[%s4891_s4 + $0x130] sm:$0xff] }
 0x111   : > { %v1122_v60 = vld.sshfl [vmem:[#allocation1] sm:$0xff pattern:$0x73625140]  ;;  %v1123_v61 = vld.sshfl [vmem:[#allocation1 + $0x8] sm:$0xff pattern:$0x73625140] }
 0x112   : > { %1330 = vmatmul.bf16.vlgmr.msrb.gmra.mxu1 %v1122_v60  ;;  %1344 = vmatmul.bf16.vlgmr.msrb.gmra.mxu3 %v1123_v61  ;;  %v1124_v62 = vld.sshfl [vmem:[#allocation1 + $0x10] sm:$0xff pattern:$0x73625140]  ;;  %v1125_v63 = vld.sshfl [vmem:[#allocation1 + $0x18] sm:$0xff pattern:$0x73625140] }
 0x113   : > { %1358 = vmatmul.bf16.vlgmr.msrb.gmra.mxu0 %v1124_v62  ;;  %1372 = vmatmul.bf16.vlgmr.msrb.gmra.mxu2 %v1125_v63  ;;  %1379 = vst [vmem:[#allocation1] ss:$4 sm:$0xff] %v973_v59  ;;  %v3828_v60 = vld [vmem:[%s4891_s4 + $0x170] sm:$0xff]  ;;  %v1762_v61 = vrot.slane %v1750_v56, 2 }
 0x114   : > { %1382 = vst [vmem:[#allocation1 + $0x1] ss:$4 sm:$0xff] %v974_v41  ;;  %2259 = vmatpush.bf16.msrb.mxu1 %v3813_v24  ;;  %2273 = vmatpush.bf16.msrb.mxu3 %v3821_v46 }
 0x115   : > { %1385 = vst [vmem:[#allocation1 + $0x2] ss:$4 sm:$0xff] %v975_v47  ;;  %v3829_v47 = vld [vmem:[%s4891_s4 + $0x178] sm:$0xff] }
 0x116   : > { %1388 = vst [vmem:[#allocation1 + $0x3] ss:$4 sm:$0xff] %v976_v57  ;;  %2287 = vmatpush.bf16.msrb.mxu0 %v3829_v47  ;;  %v1757_v57 = vrot.slane %v1745_v54, 2 }
 0x118   : > { %2260 = vmatpush.bf16.msrb.mxu1 %v3812_v31  ;;  %v1765_v62 = vsel %vm551_vm0, %v1745_v54, %v1757_v57  ;;  %v1766_v63 = vsel %vm863_vm13, %v1745_v54, %v1757_v57  ;;  %2274 = vmatpush.bf16.msrb.mxu3 %v3820_v58  ;;  %v3788_v31 = vld [vmem:[%s4891_s4 + $0x30] sm:$0xff]  ;;  %v3787_v58 = vld [vmem:[%s4891_s4 + $0x28] sm:$0xff] }
 0x11a   : > { %2288 = vmatpush.bf16.msrb.mxu0 %v3828_v60  ;;  %v3816_v60 = vld [vmem:[%s4891_s4 + $0x110] sm:$0xff] }
 0x11c   : > { %2261 = vmatpush.bf16.msrb.mxu1 %v3811_v38 }
 0x11d   : > { %v1389_v0 = vld.sshfl [vmem:[#allocation1] sm:$0xff pattern:$0x73625140]  ;;  %v1390_v1 = vld.sshfl [vmem:[#allocation1 + $0x8] sm:$0xff pattern:$0x73625140] }
 0x11e   : > { %v1391_v2 = vld.sshfl [vmem:[#allocation1 + $0x10] sm:$0xff pattern:$0x73625140]  ;;  %v1392_v3 = vld.sshfl [vmem:[#allocation1 + $0x18] sm:$0xff pattern:$0x73625140] }
 0x120   : > { %2262 = vmatpush.bf16.msrb.mxu1 %v3810_v45 }
 0x122   : > { %1597 = vmatmul.bf16.vlgmr.msra.gmra.mxu1 %v1389_v0  ;;  %1611 = vmatmul.bf16.vlgmr.msra.gmra.mxu3 %v1390_v1  ;;  %v1768_v1 = vrot.slane %v1766_v63, 2 }
 0x123   : > { %1625 = vmatmul.bf16.vlgmr.msra.gmra.mxu0 %v1391_v2  ;;  %1639 = vmatmul.bf16.vlgmr.msra.gmra.mxu2 %v1392_v3  ;;  %v3808_v2 = vld [vmem:[%s4891_s4 + $0xd0] sm:$0xff]  ;;  %v1796_v3 = vsel %vm863_vm13, %v1750_v56, %v1762_v61 }
 0x124   : > { %2263 = vmatpush.bf16.msrb.mxu1 %v3809_v55 }
 0x128   : > { %2264 = vmatpush.bf16.msrb.mxu1 %v3808_v2 }
 0x18f   : > { %v1331_v4 = vpop.f32.mrf.mxu1 }
 0x190   : > { %v1359_v5 = vpop.f32.mrf.mxu0 }
 0x195   : > { %v1345_v7 = vpop.f32.mrf.mxu3 }
 0x196   : > { %v1373_v8 = vpop.f32.mrf.mxu2  ;;  %v1346_v10 = vadd.f32 %v1345_v7, %v1331_v4  ;;  %v1799_v4 = vshrl.u32 %v1765_v62, 16  ;;  %v3819_v7 = vld [vmem:[%s4891_s4 + $0x128] sm:$0xff] }
 0x197   : > { %v1333_v9 = vpop.f32.mrf.mxu1  ;;  %2275 = vmatpush.bf16.msrb.mxu3 %v3819_v7  ;;  %v3786_v7 = vld [vmem:[%s4891_s4 + $0x20] sm:$0xff] }
 0x198   : > { %v1361_v11 = vpop.f32.mrf.mxu0  ;;  %v1360_v13 = vadd.f32 %v1359_v5, %v1346_v10  ;;  %v1802_v5 = vshll.u32 %v1765_v62, 16  ;;  %v1801_v16 = vrot.slane %v1799_v4, 6 }
 0x19a   : > { %v1374_v17 = vadd.f32 %v1373_v8, %v1360_v13  ;;  %v3827_v8 = vld [vmem:[%s4891_s4 + $0x168] sm:$0xff]  ;;  %v1808_v13 = vshll.u32 %v1768_v1, 16 }
 0x19b   : > { %2289 = vmatpush.bf16.msrb.mxu0 %v3827_v8  ;;  %v3796_v8 = vld [vmem:[%s4891_s4 + $0x70] sm:$0xff] }
 0x19d   : > { %v1347_v12 = vpop.f32.mrf.mxu3 }
 0x19e   : > { %v1375_v14 = vpop.f32.mrf.mxu2  ;;  %v1348_v18 = vadd.f32 %v1347_v12, %v1333_v9  ;;  %v3789_v9 = vld [vmem:[%s4891_s4 + $0x38] sm:$0xff] }
 0x19f   : > { %v1598_v15 = vpop.f32.mrf.mxu1  ;;  %2462 = vmatpush.bf16.msrb.mxu2 %v3789_v9  ;;  %v1730_v9 = vld [vmem:[#allocation4 + $0x10] sm:$0x7] }
 0x1a0   : > { %v1599_v19 = vadd.f32 %v1598_v15, %v1374_v17  ;;  %v1626_v20 = vpop.f32.mrf.mxu0  ;;  %v1362_v22 = vadd.f32 %v1361_v11, %v1348_v18  ;;  %v1798_v18 = vrot.slane %v1796_v3, 2 }
 0x1a2   : > { %v1376_v29 = vadd.f32 %v1375_v14, %v1362_v22 }
 0x1a3   : > { %2463 = vmatpush.bf16.msrb.mxu2 %v3788_v31 }
 0x1a5   : > { %v1612_v21 = vpop.f32.mrf.mxu3 }
 0x1a6   : > { %v1613_v23 = vadd.f32 %v1612_v21, %v1599_v19  ;;  %v1640_v25 = vpop.f32.mrf.mxu2  ;;  %v1804_v19 = vrot.slane %v1802_v5, 7  ;;  %v3815_v21 = vld [vmem:[%s4891_s4 + $0x108] sm:$0xff] }
 0x1a7   : > { %v1600_v28 = vpop.f32.mrf.mxu1  ;;  %2464 = vmatpush.bf16.msrb.mxu2 %v3787_v58 }
 0x1a8   : > { %v1627_v26 = vadd.f32 %v1626_v20, %v1613_v23  ;;  %v1601_v33 = vadd.f32 %v1600_v28, %v1376_v29  ;;  %v1628_v39 = vpop.f32.mrf.mxu0  ;;  %v3807_v20 = vld [vmem:[%s4891_s4 + $0xc8] sm:$0xff]  ;;  %v1805_v28 = vor.u32 %v1804_v19, %v1801_v16  ;;  %v1810_v29 = vrot.slane %v1808_v13, 7 }
 0x1a9   : > { %2265 = vmatpush.bf16.msrb.mxu1 %v3807_v20 }
 0x1aa   : > { %v1641_v30 = vadd.f32 %v1640_v25, %v1627_v26  ;;  %v1795_v25 = vsel %vm551_vm0, %v1750_v56, %v1762_v61  ;;  %v3818_v26 = vld [vmem:[%s4891_s4 + $0x120] sm:$0xff] }
 0x1ab   : > { %2276 = vmatpush.bf16.msrb.mxu3 %v3818_v26  ;;  %v1864_v37 = vshrl.u32 %v1795_v25, 16  ;;  %v1867_v38 = vshll.u32 %v1795_v25, 16  ;;  %v1727_v61 = vld [vmem:[#allocation4 + $0xc] sm:$0x7]  ;;  %2465 = vmatpush.bf16.msrb.mxu2 %v3786_v7 }
 0x1ac   : > { %v1649_v32 = vadd.f32 %v3898_v27, %v1641_v30  ;;  %v3826_v30 = vld [vmem:[%s4891_s4 + $0x160] sm:$0xff] }
 0x1ad   : > { %v1614_v34 = vpop.f32.mrf.mxu3  ;;  %2290 = vmatpush.bf16.msrb.mxu0 %v3826_v30  ;;  %v1866_v47 = vrot.slane %v1864_v37, 6 }
 0x1ae   : > { %v1651_v35 = vmax.f32 %v1649_v32, 0.0  ;;  %v1615_v36 = vadd.f32 %v1614_v34, %v1601_v33  ;;  %v1642_v42 = vpop.f32.mrf.mxu2 }
 0x1b0   : > { %v1653_v40 = vpack.c.bf16 %v1651_v35, %v1651_v35  ;;  %v1629_v41 = vadd.f32 %v1628_v39, %v1615_v36  ;;  %v1724_v35 = vld [vmem:[#allocation4 + $0x8] sm:$0x7]  ;;  %v1806_v36 = vrot.slane %v1805_v28, 2 }
 0x1b1   : > { %v3806_v39 = vld [vmem:[%s4891_s4 + $0xc0] sm:$0xff]  ;;  %2291 = vmatpush.bf16.msrb.mxu0 %v3825_v52 }
 0x1b2   : > { %v1663_v43 = vrot.slane %v1653_v40, 2  ;;  %v1643_v44 = vadd.f32 %v1642_v42, %v1629_v41  ;;  %v4588_v42 = vshll.u32 %v1798_v18, 16  ;;  %v1811_v46 = vsel %vm4383_vm8, %v1806_v36, %v1810_v29  ;;  %2266 = vmatpush.bf16.msrb.mxu1 %v3806_v39  ;;  %v3801_v36 = vld [vmem:[%s4891_s4 + $0x98] sm:$0xff] }
 0x1b3   : > { %1883 = vst [vmem:[#allocation5 + $0x2] sm:$0x3] %v1811_v46 }
 0x1b4   : > { %v1667_v48 = vsel %vm551_vm0, %v1653_v40, %v1663_v43  ;;  %v1668_v49 = vsel %vm863_vm13, %v1653_v40, %v1663_v43  ;;  %v1650_v50 = vadd.f32 %v3898_v27, %v1643_v44  ;;  %v1721_v27 = vld [vmem:[#allocation4 + $0x4] sm:$0x7]  ;;  %v1889_v43 = vld [vmem:[#allocation4] sm:$0x6]  ;;  %v1875_v62 = vrot.slane %v4588_v42, 7 }
 0x1b5   : > { %v1670_v51 = vrot.slane %v1668_v49, 2  ;;  %1677 = vst [vmem:[#allocation1] ss:$2 sm:$0xff] %v1667_v48  ;;  %v3817_v44 = vld [vmem:[%s4891_s4 + $0x118] sm:$0xff]  ;;  %v1901_v63 = vrot.slane %v1889_v43, 2 }
 0x1b6   : > { %v1652_v53 = vmax.f32 %v1650_v50, 0.0  ;;  %v1869_v50 = vrot.slane %v1867_v38, 7  ;;  %2277 = vmatpush.bf16.msrb.mxu3 %v3817_v44  ;;  %v3785_v42 = vld [vmem:[%s4891_s4 + $0x18] sm:$0xff] }
 0x1b7   : > { %1681 = vst [vmem:[#allocation1 + $0x10] ss:$2 sm:$0xff] %v1670_v51  ;;  %v4597_v51 = vld [vmem:[#allocation4 + $0x14] sm:$0x6]  ;;  %2466 = vmatpush.bf16.msrb.mxu2 %v3785_v42  ;;  %v3836_v42 = vld [vmem:[%s4891_s4 + $0x1b0] sm:$0xff] }
 0x1b8   : > { %v1654_v59 = vpack.c.bf16 %v1652_v53, %v1652_v53  ;;  %v1870_v57 = vor.u32 %v1869_v50, %v1866_v47 }
 0x1ba   : > { %v1664_v0 = vrot.slane %v1654_v59, 2  ;;  %v1871_v4 = vrot.slane %v1870_v57, 2  ;;  %2278 = vmatpush.bf16.msrb.mxu3 %v3816_v60 }
 0x1bc   : > { %v1678_v10 = vld.sshfl [vmem:[#allocation1] sm:$0xff pattern:$0x75643120]  ;;  %v1673_v11 = vsel %vm551_vm0, %v1654_v59, %v1664_v0  ;;  %v1674_v12 = vsel %vm863_vm13, %v1654_v59, %v1664_v0  ;;  %v3797_v59 = vld [vmem:[%s4891_s4 + $0x78] sm:$0xff]  ;;  %v3824_v0 = vld [vmem:[%s4891_s4 + $0x150] sm:$0xff] }
 0x1bd   : > { %v1676_v14 = vrot.slane %v1674_v12, 2  ;;  %1684 = vst [vmem:[#allocation1 + $0x20] ss:$2 sm:$0xff] %v1673_v11  ;;  %v1690_v15 = vshrl.u32 %v1678_v10, 16  ;;  %v1693_v23 = vshll.u32 %v1678_v10, 16  ;;  %2476 = vmatpush.bf16.msra.mxu1 %v3797_v59  ;;  %v1906_v10 = vrot.slane %v4597_v51, 2  ;;  %2292 = vmatpush.bf16.msrb.mxu0 %v3824_v0 }
 0x1be   : > { %v1682_v17 = vld.sshfl [vmem:[#allocation1 + $0x10] sm:$0xff pattern:$0x75643120]  ;;  %v1909_v11 = vsel %vm551_vm0, %v1889_v43, %v1901_v63  ;;  %v1911_v12 = vsel %vm863_vm13, %v1889_v43, %v1901_v63  ;;  %v3795_v43 = vld [vmem:[%s4891_s4 + $0x68] sm:$0xff]  ;;  %2279 = vmatpush.bf16.msrb.mxu3 %v3815_v21 }
 0x1bf   : > { %1688 = vst [vmem:[#allocation1 + $0x30] ss:$2 sm:$0xff] %v1676_v14  ;;  %v1692_v22 = vrot.slane %v1690_v15, 7  ;;  %v1696_v24 = vshrl.u32 %v1682_v17, 16  ;;  %v1699_v34 = vshll.u32 %v1682_v17, 16  ;;  %v4673_v50 = vsel %vm551_vm0, %v4597_v51, %v1906_v10 }
 0x1c0   : > { %v4677_v52 = vsel %vm863_vm13, %v4597_v51, %v1906_v10 }
 0x1c1   : > { %v1695_v32 = vor.u32 %v1693_v23, %v1692_v22  ;;  %v1698_v33 = vrot.slane %v1696_v24, 7  ;;  %v3293_v22 = vrot.slane %v1909_v11, 9  ;;  %v3294_v23 = vrot.slane %v1911_v12, 9  ;;  %2477 = vmatpush.bf16.msra.mxu1 %v3796_v8 }
 0x1c3   : > { %v1701_v40 = vor.u32 %v1699_v34, %v1698_v33  ;;  %v1722_v41 = vsel %vm4569_vm10, %v1695_v32, %v1721_v27  ;;  %v1876_v27 = vsel %vm4383_vm8, %v1871_v4, %v1875_v62 }
 0x1c4   : > { %v1685_v45 = vld.sshfl [vmem:[#allocation1 + $0x20] sm:$0xff pattern:$0x75643120]  ;;  %1723 = vst [vmem:[#allocation4 + $0x4] sm:$0x7] %v1722_v41  ;;  %v3823_v41 = vld [vmem:[%s4891_s4 + $0x148] sm:$0xff] }
 0x1c5   : > { %v1702_v48 = vshrl.u32 %v1685_v45, 16  ;;  %v1725_v49 = vsel %vm4569_vm10, %v1701_v40, %v1724_v35  ;;  %v1705_v55 = vshll.u32 %v1685_v45, 16  ;;  %1888 = vst [vmem:[#allocation5 + $0x20] sm:$0x3] %v1876_v27  ;;  %v1959_v40 = vsel %vm4654_vm12, %v3293_v22, %v3294_v23  ;;  %2293 = vmatpush.bf16.msrb.mxu0 %v3823_v41  ;;  %2478 = vmatpush.bf16.msra.mxu1 %v3795_v43  ;;  %v3782_v43 = vld [vmem:[%s4891_s4] sm:$0xff] }
 0x1c6   : > { %v1689_v53 = vld.sshfl [vmem:[#allocation1 + $0x30] sm:$0xff pattern:$0x75643120]  ;;  %1726 = vst [vmem:[#allocation4 + $0x8] sm:$0x7] %v1725_v49 }
 0x1c7   : > { %v1704_v54 = vrot.slane %v1702_v48, 7  ;;  %v1708_v56 = vshrl.u32 %v1689_v53, 16  ;;  %v1711_v3 = vshll.u32 %v1689_v53, 16  ;;  %1986 = vst [vmem:[#allocation5 + $0x4] sm:$0x3] %v1959_v40  ;;  %v3814_v53 = vld [vmem:[%s4891_s4 + $0x100] sm:$0xff] }
 0x1c8   : > { %2280 = vmatpush.bf16.msrb.mxu3 %v3814_v53 }
 0x1c9   : > { %v1707_v1 = vor.u32 %v1705_v55, %v1704_v54  ;;  %v1710_v2 = vrot.slane %v1708_v56, 7  ;;  %v3822_v54 = vld [vmem:[%s4891_s4 + $0x140] sm:$0xff]  ;;  %v3784_v55 = vld [vmem:[%s4891_s4 + $0x10] sm:$0xff] }
 0x1ca   : > { %2294 = vmatpush.bf16.msrb.mxu0 %v3822_v54  ;;  %2467 = vmatpush.bf16.msrb.mxu2 %v3784_v55 }
 0x1cb   : > { %v1713_v13 = vor.u32 %v1711_v3, %v1710_v2  ;;  %v1728_v14 = vsel %vm4569_vm10, %v1707_v1, %v1727_v61  ;;  %v1734_v15 = vld [vmem:[#allocation4 + $0x4] sm:$0x3] }
 0x1cc   : > { %v1746_v16 = vld [vmem:[#allocation4 + $0x4] sm:$0x7]  ;;  %1729 = vst [vmem:[#allocation4 + $0xc] sm:$0x7] %v1728_v14 }
 0x1cd   : > { %v1890_v17 = vld [vmem:[#allocation4 + $0x4] sm:$0x6]  ;;  %v1758_v18 = vrot.slane %v1746_v16, 2  ;;  %v1731_v24 = vsel %vm4569_vm10, %v1713_v13, %v1730_v9  ;;  %v1735_v25 = vld [vmem:[#allocation4 + $0x8] sm:$0x3] }
 0x1ce   : > { %v1902_v19 = vrot.slane %v1890_v17, 2  ;;  %1740 = vst [vmem:[#allocation5 + $0x6] sm:$0x3] %v1734_v15  ;;  %v1747_v26 = vld [vmem:[#allocation4 + $0x8] sm:$0x7] }
 0x1cf   : > { %1732 = vst [vmem:[#allocation4 + $0x10] sm:$0x7] %v1731_v24  ;;  %v1759_v28 = vrot.slane %v1747_v26, 2  ;;  %v1771_v29 = vsel %vm551_vm0, %v1746_v16, %v1758_v18  ;;  %v1772_v30 = vsel %vm863_vm13, %v1746_v16, %v1758_v18  ;;  %v1891_v31 = vld [vmem:[#allocation4 + $0x8] sm:$0x6] }
 0x1d0   : > { %1741 = vst [vmem:[#allocation5 + $0xc] sm:$0x3] %v1735_v25  ;;  %v1774_v32 = vrot.slane %v1772_v30, 2  ;;  %v1812_v33 = vshrl.u32 %v1771_v29, 16  ;;  %v1815_v34 = vshll.u32 %v1771_v29, 16  ;;  %v4649_v35 = vsel %vm551_vm0, %v1890_v17, %v1902_v19  ;;  %v3794_v13 = vld [vmem:[%s4891_s4 + $0x60] sm:$0xff] }
 0x1d1   : > { %v1777_v37 = vsel %vm551_vm0, %v1747_v26, %v1759_v28  ;;  %v1778_v38 = vsel %vm863_vm13, %v1747_v26, %v1759_v28  ;;  %v1903_v39 = vrot.slane %v1891_v31, 2  ;;  %v4689_v60 = vsel %vm863_vm13, %v1890_v17, %v1902_v19  ;;  %v3805_v19 = vld [vmem:[%s4891_s4 + $0xb8] sm:$0xff]  ;;  %2479 = vmatpush.bf16.msra.mxu1 %v3794_v13  ;;  %v3783_v30 = vld [vmem:[%s4891_s4 + $0x8] sm:$0xff] }
 0x1d2   : > { %v1780_v44 = vrot.slane %v1778_v38, 2  ;;  %v1814_v45 = vrot.slane %v1812_v33, 6  ;;  %v1817_v46 = vrot.slane %v1815_v34, 7  ;;  %v1821_v47 = vshll.u32 %v1774_v32, 16  ;;  %2490 = vmatpush.bf16.msra.mxu3 %v3805_v19  ;;  %v3837_v29 = vld [vmem:[%s4891_s4 + $0x1b8] sm:$0xff]  ;;  %2468 = vmatpush.bf16.msrb.mxu2 %v3783_v30  ;;  %v3843_v13 = vld [vmem:[%s4891_s4 + $0x1e8] sm:$0xff] }
 0x1d3   : > { %v1825_v48 = vshrl.u32 %v1777_v37, 16  ;;  %v1828_v49 = vshll.u32 %v1777_v37, 16  ;;  %v1736_v56 = vld [vmem:[#allocation4 + $0xc] sm:$0x3]  ;;  %v3295_v0 = vrot.slane %v4649_v35, 9  ;;  %v4693_v5 = vsel %vm551_vm0, %v1891_v31, %v1903_v39  ;;  %v3793_v34 = vld [vmem:[%s4891_s4 + $0x58] sm:$0xff]  ;;  %2719 = vmatpush.bf16.msra.mxu0 %v3837_v29 }
 0x1d4   : > { %v1748_v57 = vld [vmem:[#allocation4 + $0xc] sm:$0x7]  ;;  %v1818_v58 = vor.u32 %v1817_v46, %v1814_v45  ;;  %v1823_v59 = vrot.slane %v1821_v47, 7  ;;  %v1834_v51 = vshll.u32 %v1780_v44, 16  ;;  %1742 = vst [vmem:[#allocation5 + $0x12] sm:$0x3] %v1736_v56  ;;  %v4696_v7 = vsel %vm863_vm13, %v1891_v31, %v1903_v39 }
 0x1d5   : > { %v1760_v61 = vrot.slane %v1748_v57, 2  ;;  %v1827_v62 = vrot.slane %v1825_v48, 6  ;;  %v1830_v63 = vrot.slane %v1828_v49, 7  ;;  %v1892_v12 = vld [vmem:[#allocation4 + $0xc] sm:$0x6]  ;;  %v3804_v37 = vld [vmem:[%s4891_s4 + $0xb0] sm:$0xff]  ;;  %2480 = vmatpush.bf16.msra.mxu1 %v3793_v34 }
 0x1d6   : > { %v1737_v1 = vld [vmem:[#allocation4 + $0x10] sm:$0x3]  ;;  %v1819_v3 = vrot.slane %v1818_v58, 2  ;;  %v1836_v4 = vrot.slane %v1834_v51, 7  ;;  %v1904_v24 = vrot.slane %v1892_v12, 2  ;;  %v3792_v48 = vld [vmem:[%s4891_s4 + $0x50] sm:$0xff]  ;;  %2491 = vmatpush.bf16.msra.mxu3 %v3804_v37  ;;  %2469 = vmatpush.bf16.msrb.mxu2 %v3782_v43 }
 0x1d7   : > { %v1749_v2 = vld [vmem:[#allocation4 + $0x10] sm:$0x7]  ;;  %1743 = vst [vmem:[#allocation5 + $0x18] sm:$0x3] %v1737_v1  ;;  %v1783_v9 = vsel %vm551_vm0, %v1748_v57, %v1760_v61  ;;  %v1784_v10 = vsel %vm863_vm13, %v1748_v57, %v1760_v61  ;;  %v1831_v11 = vor.u32 %v1830_v63, %v1827_v62  ;;  %v3845_v49 = vld [vmem:[%s4891_s4 + $0x1f8] sm:$0xff]  ;;  %v3296_v56 = vrot.slane %v4689_v60, 9  ;;  %2720 = vmatpush.bf16.msra.mxu0 %v3836_v42 }
 0x1d8   : > { %v1761_v8 = vrot.slane %v1749_v2, 2  ;;  %v1786_v14 = vrot.slane %v1784_v10, 2  ;;  %v1824_v15 = vsel %vm4383_vm8, %v1819_v3, %v1823_v59  ;;  %v1838_v16 = vshrl.u32 %v1783_v9, 16  ;;  %v1893_v18 = vld [vmem:[#allocation4 + $0x10] sm:$0x6]  ;;  %v3802_v10 = vld [vmem:[%s4891_s4 + $0xa0] sm:$0xff] }
 0x1d9   : > { %v1841_v17 = vshll.u32 %v1783_v9, 16  ;;  %v1832_v23 = vrot.slane %v1831_v11, 2  ;;  %1884 = vst [vmem:[#allocation5 + $0x8] sm:$0x3] %v1824_v15  ;;  %v1905_v33 = vrot.slane %v1893_v18, 2  ;;  %v1930_v41 = vsel %vm551_vm0, %v1892_v12, %v1904_v24  ;;  %v3803_v57 = vld [vmem:[%s4891_s4 + $0xa8] sm:$0xff]  ;;  %2481 = vmatpush.bf16.msra.mxu1 %v3792_v48 }
 0x1da   : > { %v1789_v20 = vsel %vm551_vm0, %v1749_v2, %v1761_v8  ;;  %v1790_v22 = vsel %vm863_vm13, %v1749_v2, %v1761_v8  ;;  %v1840_v26 = vrot.slane %v1838_v16, 6  ;;  %v1847_v28 = vshll.u32 %v1786_v14, 16  ;;  %v3835_v2 = vld [vmem:[%s4891_s4 + $0x1a8] sm:$0xff]  ;;  %2733 = vmatpush.bf16.msra.mxu2 %v3845_v49  ;;  %2492 = vmatpush.bf16.msra.mxu3 %v3803_v57  ;;  %v3833_v14 = vld [vmem:[%s4891_s4 + $0x198] sm:$0xff]  ;;  %v3842_v16 = vld [vmem:[%s4891_s4 + $0x1e0] sm:$0xff] }
 0x1db   : > { %v1792_v25 = vrot.slane %v1790_v22, 2  ;;  %v1843_v27 = vrot.slane %v1841_v17, 7  ;;  %v1837_v31 = vsel %vm4383_vm8, %v1832_v23, %v1836_v4  ;;  %v1851_v21 = vshrl.u32 %v1789_v20, 16  ;;  %v3791_v3 = vld [vmem:[%s4891_s4 + $0x48] sm:$0xff]  ;;  %2721 = vmatpush.bf16.msra.mxu0 %v3835_v2  ;;  %v3841_v23 = vld [vmem:[%s4891_s4 + $0x1d8] sm:$0xff]  ;;  %v3830_v30 = vld [vmem:[%s4891_s4 + $0x180] sm:$0xff] }
 0x1dc   : > { %v1854_v32 = vshll.u32 %v1789_v20, 16  ;;  %v1849_v39 = vrot.slane %v1847_v28, 7  ;;  %1885 = vst [vmem:[#allocation5 + $0xe] sm:$0x3] %v1837_v31  ;;  %v1932_v46 = vsel %vm863_vm13, %v1892_v12, %v1904_v24  ;;  %v1937_v47 = vsel %vm551_vm0, %v1893_v18, %v1905_v33  ;;  %v3832_v20 = vld [vmem:[%s4891_s4 + $0x190] sm:$0xff]  ;;  %v3799_v24 = vld [vmem:[%s4891_s4 + $0x88] sm:$0xff] }
 0x1dd   : > { %v1844_v38 = vor.u32 %v1843_v27, %v1840_v26  ;;  %v1860_v40 = vshll.u32 %v1792_v25, 16  ;;  %v1853_v44 = vrot.slane %v1851_v21, 6  ;;  %v1939_v55 = vsel %vm863_vm13, %v1893_v18, %v1905_v33  ;;  %2482 = vmatpush.bf16.msra.mxu1 %v3791_v3  ;;  %v3800_v18 = vld [vmem:[%s4891_s4 + $0x90] sm:$0xff]  ;;  %v3831_v25 = vld [vmem:[%s4891_s4 + $0x188] sm:$0xff]  ;;  %v3798_v27 = vld [vmem:[%s4891_s4 + $0x80] sm:$0xff] }
 0x1de   : > { %v1856_v45 = vrot.slane %v1854_v32, 7  ;;  %v3297_v59 = vrot.slane %v4693_v5, 9  ;;  %v3298_v51 = vrot.slane %v4696_v7, 9  ;;  %v3299_v61 = vrot.slane %v1930_v41, 9  ;;  %v3844_v7 = vld [vmem:[%s4891_s4 + $0x1f0] sm:$0xff]  ;;  %2493 = vmatpush.bf16.msra.mxu3 %v3802_v10  ;;  %v3853_v28 = vld [vmem:[%s4891_s4 + $0x238] sm:$0xff] }
 0x1df   : > { %v1845_v53 = vrot.slane %v1844_v38, 2  ;;  %v1862_v54 = vrot.slane %v1860_v40, 7  ;;  %v1963_v63 = vsel %vm4654_vm12, %v3295_v0, %v3296_v56  ;;  %v3300_v60 = vrot.slane %v1932_v46, 9  ;;  %2734 = vmatpush.bf16.msra.mxu2 %v3844_v7  ;;  %v3840_v26 = vld [vmem:[%s4891_s4 + $0x1d0] sm:$0xff]  ;;  %v3839_v31 = vld [vmem:[%s4891_s4 + $0x1c8] sm:$0xff]  ;;  %v3850_v42 = vld [vmem:[%s4891_s4 + $0x220] sm:$0xff] }
 0x1e0   : > { %v1857_v58 = vor.u32 %v1856_v45, %v1853_v44  ;;  %v3301_v1 = vrot.slane %v1937_v47, 9  ;;  %v1967_v35 = vsel %vm4654_vm12, %v3297_v59, %v3298_v51  ;;  %v3302_v5 = vrot.slane %v1939_v55, 9  ;;  %1987 = vst [vmem:[#allocation5 + $0xa] sm:$0x3] %v1963_v63  ;;  %v1992_v29 = vld [vmem:[#allocation5] sm:$0x3f] }
 0x1e1   : > { %v1850_v62 = vsel %vm4383_vm8, %v1845_v53, %v1849_v39  ;;  %v3303_v0 = vrot.slane %v4673_v50, 9  ;;  %v1971_v8 = vsel %vm4654_vm12, %v3299_v61, %v3300_v60  ;;  %v3304_v9 = vrot.slane %v4677_v52, 9  ;;  %1988 = vst [vmem:[#allocation5 + $0x10] sm:$0x3] %v1967_v35  ;;  %v3834_v52 = vld [vmem:[%s4891_s4 + $0x1a0] sm:$0xff]  ;;  %2483 = vmatpush.bf16.msra.mxu1 %v3790_v6  ;;  %v3852_v37 = vld [vmem:[%s4891_s4 + $0x230] sm:$0xff] }
 0x1e2   : > { %v1858_v4 = vrot.slane %v1857_v58, 2  ;;  %1886 = vst [vmem:[#allocation5 + $0x14] sm:$0x3] %v1850_v62  ;;  %v1975_v11 = vsel %vm4654_vm12, %v3301_v1, %v3302_v5  ;;  %2722 = vmatpush.bf16.msra.mxu0 %v3834_v52  ;;  %2494 = vmatpush.bf16.msra.mxu3 %v3801_v36  ;;  %v3838_v39 = vld [vmem:[%s4891_s4 + $0x1c0] sm:$0xff]  ;;  %v3851_v41 = vld [vmem:[%s4891_s4 + $0x228] sm:$0xff]  ;;  %v3849_v49 = vld [vmem:[%s4891_s4 + $0x218] sm:$0xff] }
 0x1e3   : > { %v1979_v12 = vsel %vm4654_vm12, %v3303_v0, %v3304_v9  ;;  %1989 = vst [vmem:[#allocation5 + $0x16] sm:$0x3] %v1971_v8  ;;  %2735 = vmatpush.bf16.msra.mxu2 %v3843_v13  ;;  %v3847_v55 = vld [vmem:[%s4891_s4 + $0x208] sm:$0xff]  ;;  %v3846_v57 = vld [vmem:[%s4891_s4 + $0x200] sm:$0xff] }
 0x1e4   : > { %v1863_v50 = vsel %vm4383_vm8, %v1858_v4, %v1862_v54  ;;  %1990 = vst [vmem:[#allocation5 + $0x1c] sm:$0x3] %v1975_v11  ;;  %v3848_v54 = vld [vmem:[%s4891_s4 + $0x210] sm:$0xff] }
 0x1e5   : > { %1887 = vst [vmem:[#allocation5 + $0x1a] sm:$0x3] %v1863_v50 }
 0x1e6   : > { %1991 = vst [vmem:[#allocation5 + $0x22] sm:$0x3] %v1979_v12  ;;  %2723 = vmatpush.bf16.msra.mxu0 %v3833_v14  ;;  %2495 = vmatpush.bf16.msra.mxu3 %v3800_v18  ;;  %v3899_v14 = vld [vmem:[%s4892_s5] ss:$0 sm:$0xff] }
 0x1e7   : > { %v2045_v15 = vld [vmem:[#allocation5 + $0x6] sm:$0x3f]  ;;  %2736 = vmatpush.bf16.msra.mxu2 %v3842_v16 }
 0x1e8   : > { %v2046_v17 = vld [vmem:[#allocation5 + $0xc] sm:$0x3f]  ;;  %2099 = vst [vmem:[#allocation1] ss:$4 sm:$0xff] %v2045_v15  ;;  %v1993_v34 = vld [vmem:[#allocation5 + $0x6] sm:$0x3f] }
 0x1e9   : > { %2102 = vst [vmem:[#allocation1 + $0x1] ss:$4 sm:$0xff] %v2046_v17  ;;  %v1994_v38 = vld [vmem:[#allocation5 + $0xc] sm:$0x3f] }
 0x1ea   : > { %v2047_v19 = vld [vmem:[#allocation5 + $0x12] sm:$0x3f]  ;;  %2724 = vmatpush.bf16.msra.mxu0 %v3832_v20  ;;  %2496 = vmatpush.bf16.msra.mxu3 %v3799_v24  ;;  %v2505_v43 = vld [vmem:[#allocation5 + $0xc] sm:$0x3f] }
 0x1eb   : > { %2105 = vst [vmem:[#allocation1 + $0x2] ss:$4 sm:$0xff] %v2047_v19  ;;  %2737 = vmatpush.bf16.msra.mxu2 %v3841_v23  ;;  %v1995_v40 = vld [vmem:[#allocation5 + $0x12] sm:$0x3f] }
 0x1ec   : > { %v2048_v22 = vld [vmem:[#allocation5 + $0x18] sm:$0x3f]  ;;  %v2506_v46 = vld [vmem:[#allocation5 + $0x12] sm:$0x3f] }
 0x1ed   : > { %2108 = vst [vmem:[#allocation1 + $0x3] ss:$4 sm:$0xff] %v2048_v22  ;;  %v2508_v48 = vld [vmem:[#allocation5 + $0x1e] sm:$0x3f]  ;;  %v2507_v53 = vld [vmem:[#allocation5 + $0x18] sm:$0x3f] }
 0x1ee   : > { %2725 = vmatpush.bf16.msra.mxu0 %v3831_v25  ;;  %2497 = vmatpush.bf16.msra.mxu3 %v3798_v27 }
 0x1ef   : > { %2738 = vmatpush.bf16.msra.mxu2 %v3840_v26 }
 0x1f2   : > { %2726 = vmatpush.bf16.msra.mxu0 %v3830_v30 }
 0x1f3   : > { %2739 = vmatpush.bf16.msra.mxu2 %v3839_v31 }
 0x1f4   : > { %v2109_v21 = vld.sshfl [vmem:[#allocation1] sm:$0xff pattern:$0x73625140]  ;;  %v2110_v32 = vld.sshfl [vmem:[#allocation1 + $0x8] sm:$0xff pattern:$0x73625140] }
 0x1f5   : > { %2267 = vmatmul.bf16.vlgmr.msrb.gmra.mxu1 %v2109_v21  ;;  %2281 = vmatmul.bf16.vlgmr.msrb.gmra.mxu3 %v2110_v32  ;;  %v2111_v33 = vld.sshfl [vmem:[#allocation1 + $0x10] sm:$0xff pattern:$0x73625140] }
 0x1f6   : > { %2295 = vmatmul.bf16.vlgmr.msrb.gmra.mxu0 %v2111_v33  ;;  %2302 = vst [vmem:[#allocation1] ss:$4 sm:$0xff] %v1992_v29  ;;  %2747 = vmatpush.bf16.msrb.mxu1 %v3853_v28 }
 0x1f7   : > { %2305 = vst [vmem:[#allocation1 + $0x1] ss:$4 sm:$0xff] %v1993_v34  ;;  %2740 = vmatpush.bf16.msra.mxu2 %v3838_v39 }
 0x1f8   : > { %2308 = vst [vmem:[#allocation1 + $0x2] ss:$4 sm:$0xff] %v1994_v38 }
 0x1f9   : > { %2311 = vst [vmem:[#allocation1 + $0x3] ss:$4 sm:$0xff] %v1995_v40 }
 0x1fa   : > { %2748 = vmatpush.bf16.msrb.mxu1 %v3852_v37 }
 0x1fe   : > { %2749 = vmatpush.bf16.msrb.mxu1 %v3851_v41 }
 0x200   : > { %v2312_v44 = vld.sshfl [vmem:[#allocation1] sm:$0xff pattern:$0x73625140]  ;;  %v2313_v45 = vld.sshfl [vmem:[#allocation1 + $0x8] sm:$0xff pattern:$0x73625140] }
 0x201   : > { %2470 = vmatmul.bf16.vlgmr.msrb.gmra.mxu2 %v2312_v44  ;;  %v2314_v47 = vld.sshfl [vmem:[#allocation1 + $0x10] sm:$0xff pattern:$0x73625140] }
 0x202   : > { %2750 = vmatpush.bf16.msrb.mxu1 %v3850_v42  ;;  %2559 = vst [vmem:[#allocation1] ss:$4 sm:$0xff] %v2505_v43 }
 0x203   : > { %2562 = vst [vmem:[#allocation1 + $0x1] ss:$4 sm:$0xff] %v2506_v46 }
 0x204   : > { %2565 = vst [vmem:[#allocation1 + $0x2] ss:$4 sm:$0xff] %v2507_v53 }
 0x205   : > { %2484 = vmatmul.bf16.vlgmr.msra.gmra.mxu1 %v2313_v45  ;;  %2498 = vmatmul.bf16.vlgmr.msra.gmra.mxu3 %v2314_v47  ;;  %2568 = vst [vmem:[#allocation1 + $0x3] ss:$4 sm:$0xff] %v2508_v48 }
 0x206   : > { %2751 = vmatpush.bf16.msrb.mxu1 %v3849_v49 }
 0x20a   : > { %2752 = vmatpush.bf16.msrb.mxu1 %v3848_v54 }
 0x20c   : > { %v2569_v56 = vld.sshfl [vmem:[#allocation1] sm:$0xff pattern:$0x73625140]  ;;  %v2570_v58 = vld.sshfl [vmem:[#allocation1 + $0x8] sm:$0xff pattern:$0x73625140] }
 0x20d   : > { %2727 = vmatmul.bf16.vlgmr.msra.gmra.mxu0 %v2569_v56  ;;  %v2571_v59 = vld.sshfl [vmem:[#allocation1 + $0x10] sm:$0xff pattern:$0x73625140] }
 0x20e   : > { %2753 = vmatpush.bf16.msrb.mxu1 %v3847_v55 }
 0x211   : > { %2741 = vmatmul.bf16.vlgmr.msra.gmra.mxu2 %v2570_v58 }
 0x212   : > { %2754 = vmatpush.bf16.msrb.mxu1 %v3846_v57 }
 0x215   : > { %2755 = vmatmul.bf16.vlgmr.msrb.gmra.mxu1 %v2571_v59 }
 0x272   : > { %v2268_v51 = vpop.f32.mrf.mxu1 }
 0x273   : > { %v2296_v62 = vpop.f32.mrf.mxu0 }
 0x278   : > { %v2282_v63 = vpop.f32.mrf.mxu3 }
 0x279   : > { %v2283_v35 = vadd.f32 %v2282_v63, %v2268_v51 }
 0x27a   : > { %v2270_v61 = vpop.f32.mrf.mxu1 }
 0x27b   : > { %v2298_v2 = vpop.f32.mrf.mxu0  ;;  %v2297_v0 = vadd.f32 %v2296_v62, %v2283_v35 }
 0x280   : > { %v2284_v3 = vpop.f32.mrf.mxu3 }
 0x281   : > { %v2285_v50 = vadd.f32 %v2284_v3, %v2270_v61 }
 0x282   : > { %v2485_v60 = vpop.f32.mrf.mxu1 }
 0x283   : > { %v2299_v6 = vadd.f32 %v2298_v2, %v2285_v50 }
 0x284   : > { %v2471_v1 = vpop.f32.mrf.mxu2 }
 0x285   : > { %v2472_v7 = vadd.f32 %v2471_v1, %v2297_v0 }
 0x287   : > { %v2486_v12 = vadd.f32 %v2485_v60, %v2472_v7 }
 0x288   : > { %v2499_v9 = vpop.f32.mrf.mxu3 }
 0x289   : > { %v2500_v13 = vadd.f32 %v2499_v9, %v2486_v12 }
 0x28a   : > { %v2487_v4 = vpop.f32.mrf.mxu1  ;;  %v2728_v8 = vpop.f32.mrf.mxu0 }
 0x28c   : > { %v2473_v5 = vpop.f32.mrf.mxu2 }
 0x28d   : > { %v2474_v15 = vadd.f32 %v2473_v5, %v2299_v6 }
 0x28f   : > { %v2488_v23 = vadd.f32 %v2487_v4, %v2474_v15 }
 0x290   : > { %v2501_v18 = vpop.f32.mrf.mxu3 }
 0x291   : > { %v2502_v26 = vadd.f32 %v2501_v18, %v2488_v23 }
 0x292   : > { %v2756_v10 = vpop.f32.mrf.mxu1  ;;  %v2730_v17 = vpop.f32.mrf.mxu0 }
 0x294   : > { %v2742_v11 = vpop.f32.mrf.mxu2 }
 0x295   : > { %v2743_v52 = vadd.f32 %v2742_v11, %v2728_v8 }
 0x297   : > { %v2757_v36 = vadd.f32 %v2756_v10, %v2743_v52 }
 0x299   : > { %v2761_v16 = vadd.f32 %v2757_v36, %v2500_v13 }
 0x29a   : > { %v2758_v22 = vpop.f32.mrf.mxu1 }
 0x29b   : > { %v2767_v19 = vadd.f32 %v3899_v14, %v2761_v16 }
 0x29c   : > { %v2744_v20 = vpop.f32.mrf.mxu2 }
 0x29d   : > { %v2771_v24 = vrot.slane %v2767_v19, 4  ;;  %2775 = vst [vmem:[%s244_s16] sm:$0xf] %v2767_v19  ;;  %v2745_v25 = vadd.f32 %v2744_v20, %v2730_v17 }
 0x29f   : > { %2776 = vst [vmem:[%s244_s16 + $0x4] sm:$0xf] %v2771_v24  ;;  %v2759_v27 = vadd.f32 %v2758_v22, %v2745_v25 }
 0x2a1   : > { %v2762_v28 = vadd.f32 %v2759_v27, %v2502_v26 }
 0x2a3   : > { %v2768_v29 = vadd.f32 %v3899_v14, %v2762_v28 }
 0x2a5   : > { %v2772_v30 = vrot.slane %v2768_v29, 4  ;;  %2777 = vst [vmem:[%s244_s16 + $0x8] sm:$0xf] %v2768_v29 }
 0x2a7   : > { %2778 = vst [vmem:[%s244_s16 + $0xc] sm:$0xf] %v2772_v30 }
 0x2a8   : > { %3927 = shalt.err (!%p3924_p3)
}
 0x2a9   : > { %s3965_s11 = smov 64   ;;  %s3966_s15 = smov 4  }
 0x2aa   : > { %3856 = dma.vmem_to_hbm [thread:$0]  (%p4040_p5), %s2793_s19, 256, %s2795_s26, %s2780_s25, %s3965_s11, %s3965_s11, %s3966_s15  }
 0x2ab PF: > { %p3862_p4 = scmp.ge.s32.totalorder %s3962_s24, 2  ;;  %s2809_s16 = sand.u32 1, %s3950_s21  }
 0x2ac   : > { %s2810_s17 = scalar_lea.sflag [#allocation7], %s2809_s16 }
 0x2ad   : > { %p3859_p7 = pnand %p3862_p4, %p4044_p6 }
 0x2af   : > { %p3860_p8 = pneg %p3859_p7 }
 0x2b1   : > { %3945 = dma.done.wait (%p3860_p8), %s2810_s17, 256  }
 0x2b2   : > { %3947 = vsyncadd (%p3860_p8), %s2810_s17, 4294967040  ;;  %p16_p9 = scmp.ge.s32.totalorder %s4027_s27, 4   ;;  %s4914_s21 = smov %s3954_s22 }
 0x2b3   : > { %s4915_s22 = smov %s3958_s23  ;;  %s4916_s23 = smov %s4038_s30 }
 0x2b4   : > { %s4917_s24 = smov %s4027_s27  ;;  %18 = sbr.rel (!%p16_p9) target bundleno = 3 (0x3), region = 116 }
 0x2b9   :  { %2816 = vsyncpa [#allocation7], 1 }
 0x2ba   :  { %2818 = vsyncpa [#allocation7 + $0x1], 1 }

</bundles_post_ra>
